<compile_context>
chip_gen: v7x
topology: tpu7x:2x2x1
jax: 0.10.0
libtpu: 0.0.40
codegen_flags: <defaults>
</compile_context>

<pallas_src>
import functools

import jax
import jax.numpy as jnp
from jax.experimental import pallas as pl
from jax.experimental.pallas import tpu as pltpu

# ----------------------------- model config ---------------------------------
VOCAB = 50          # input_dim
EMB = 32            # embedding_dim
HID = 32            # hidden_dim
OUT = 4             # output_dim
N_LAYERS = 2
PAD_IDX = 0
SEQ = 8
BATCH = 2

B_PAD = 8           # batch padded to sublane width (rows >= BATCH are don't-care)
VOCAB_PAD = 64      # vocab padded for the in-kernel one-hot matmul


# --------------------------- fused Pallas kernel -----------------------------
def fused_lstm_kernel(tok_ref, embproj_ref, wrec0_ref,
                      wih1_ref, b1_ref, wrec1_ref,
                      lw_ref, lb_ref,
                      out_ref,
                      pre_buf, x1_buf,
                      *, seq_len, bpad, hidden, vocab_pad):
    """Entire forward pass (embedding + 2 bidirectional LSTM layers + linear) in VMEM.

    tok_ref:     (S*Bp, 1)  int32 token ids, time-major, batch padded to Bp
    embproj_ref: (Vp, 8H)   bf16   emb[v] @ [Wih_f | Wih_b] + [b_f | b_b]  (pre-folded)
    wrec0/1_ref: (H, 8H)    bf16   [Whh_fwd | Whh_bwd] per layer
    wih1_ref:    (2H, 8H)   bf16   layer-1 [Wih_f | Wih_b]
    b1_ref:      (1, 8H)    f32
    lw_ref:      (2H, OUT)  f32,  lb_ref: (1, OUT) f32
    out_ref:     (Bp, OUT)  f32
    pre_buf:     (S*Bp, 8H) f32 scratch (per-layer hoisted input projection)
    x1_buf:      (S*Bp, 2H) f32 scratch (layer-0 bidirectional outputs = layer-1 input)
    """
    S, Bp, H = seq_len, bpad, hidden
    G = 4 * H            # 128: gate width of one direction
    R = 2 * Bp           # 16 : stacked fwd (rows [0:Bp)) + bwd (rows [Bp:R)) batch rows
    f32, bf16 = jnp.float32, jnp.bfloat16

    # Loop-invariant lane mask: lanes [2H, 3H) of each 4H gate row hold the tanh (g) gate.
    lane = jax.lax.broadcasted_iota(jnp.int32, (R, G), 1)
    g_mask = (lane >= 2 * H) & (lane < 3 * H)

    def run_layer(w_rec, write_outputs):
        """fwd+bwd recurrence over pre_buf; optionally stores per-step outputs to x1_buf."""
        h = jnp.zeros((R, H), f32)
        c = jnp.zeros((R, H), f32)
        for s in range(S):                     # fully unrolled serial recurrence (S = 8)
            tb = S - 1 - s                     # backward-direction time index
            # One fused recurrent matmul for both directions: (16,32) x (32,256) -> (16,256)
            rec = jnp.dot(h.astype(bf16), w_rec, preferred_element_type=f32)
            # Aligned (8,128) slices: fwd gates from lanes [0,G), bwd from lanes [G,2G).
            gates = jnp.concatenate(
                [pre_buf[s * Bp:(s + 1) * Bp, 0:G] + rec[0:Bp, 0:G],
                 pre_buf[tb * Bp:(tb + 1) * Bp, G:2 * G] + rec[Bp:R, G:2 * G]],
                axis=0)                        # (16, 128)
            # Single EUP pass over the whole row: sigmoid(x) = 0.5*tanh(0.5x) + 0.5.
            t = jnp.tanh(jnp.where(g_mask, gates, 0.5 * gates))
            act = jnp.where(g_mask, t, 0.5 * t + 0.5)
            i = act[:, 0 * H:1 * H]
            f = act[:, 1 * H:2 * H]
            g = act[:, 2 * H:3 * H]
            o = act[:, 3 * H:4 * H]
            c = f * c + i * g                  # f32 elementwise (VPU)
            h = o * jnp.tanh(c)                # second (unavoidable) EUP pass
            if write_outputs:
                x1_buf[s * Bp:(s + 1) * Bp, 0:H] = h[0:Bp]          # fwd output @ time s
                x1_buf[tb * Bp:(tb + 1) * Bp, H:2 * H] = h[Bp:R]    # bwd output @ time tb
        return h

    # ---- layer 0: embedding gather folded into the input projection (one-hot matmul) ----
    tok = tok_ref[...]                                              # (S*Bp, 1) int32
    viota = jax.lax.broadcasted_iota(jnp.int32, (S * Bp, vocab_pad), 1)
    onehot = jnp.where(viota == tok, 1.0, 0.0).astype(bf16)         # (S*Bp, Vp)
    pre_buf[...] = jnp.dot(onehot, embproj_ref[...], preferred_element_type=f32)
    run_layer(wrec0_ref[...], write_outputs=True)

    # ---- layer 1: hoisted input projection over all timesteps & both directions ----
    pre_buf[...] = (jnp.dot(x1_buf[...].astype(bf16), wih1_ref[...],
                            preferred_element_type=f32) + b1_ref[...])
    h1 = run_layer(wrec1_ref[...], write_outputs=False)

    # ---- final linear on concat(final fwd hidden, final bwd hidden) ----
    hidden_cat = jnp.concatenate([h1[0:Bp], h1[Bp:R]], axis=1)      # (Bp, 2H) f32
    out_ref[...] = (jnp.dot(hidden_cat, lw_ref[...], preferred_element_type=f32)
                    + lb_ref[...])


# ------------------------------ wrappers -------------------------------------
def fuse_params(params):
    """Pack per-direction weights into the fused kernel layout (done once, host side)."""
    emb = params["embedding"]                                        # (VOCAB, EMB)
    emb_pad = jnp.zeros((VOCAB_PAD, EMB), jnp.float32).at[:VOCAB].set(emb)

    wif0, whf0, bf0 = params["layers"][0]["fwd"]
    wib0, whb0, bb0 = params["layers"][0]["bwd"]
    wih0_cat = jnp.concatenate([wif0, wib0], axis=1)                 # (EMB, 8H)
    b0_cat = jnp.concatenate([bf0, bb0], axis=1)                     # (1, 8H)
    # Fold embedding row + layer-0 input projection + bias into one selectable table.
    emb_proj = (emb_pad @ wih0_cat + b0_cat).astype(jnp.bfloat16)    # (VOCAB_PAD, 8H)
    wrec0 = jnp.concatenate([whf0, whb0], axis=1).astype(jnp.bfloat16)   # (H, 8H)

    wif1, whf1, bf1 = params["layers"][1]["fwd"]
    wib1, whb1, bb1 = params["layers"][1]["bwd"]
    wih1_cat = jnp.concatenate([wif1, wib1], axis=1).astype(jnp.bfloat16)  # (2H, 8H)
    b1_cat = jnp.concatenate([bf1, bb1], axis=1)                     # (1, 8H) f32
    wrec1 = jnp.concatenate([whf1, whb1], axis=1).astype(jnp.bfloat16)

    return {"emb_proj": emb_proj, "wrec0": wrec0,
            "wih1": wih1_cat, "b1": b1_cat, "wrec1": wrec1,
            "linear_w": params["linear_w"], "linear_b": params["linear_b"]}


@jax.jit
def lstm_model_forward(text, fused):
    """Full forward matching the PyTorch module (eval mode: dropout = identity)."""
    S, B = text.shape
    # Pad batch to the 8-row sublane width; padded rows carry the pad token (zero emb row).
    text_pad = jnp.full((S, B_PAD), PAD_IDX, jnp.int32).at[:, :B].set(text)
    tok = text_pad.reshape(S * B_PAD, 1)

    kernel = functools.partial(fused_lstm_kernel, seq_len=S, bpad=B_PAD,
                               hidden=HID, vocab_pad=VOCAB_PAD)
    out_pad = pl.pallas_call(
        kernel,
        out_shape=jax.ShapeDtypeStruct((B_PAD, OUT), jnp.float32),
        in_specs=[pl.BlockSpec(memory_space=pltpu.MemorySpace.VMEM)] * 8,
        out_specs=pl.BlockSpec(memory_space=pltpu.MemorySpace.VMEM),
        scratch_shapes=[pltpu.VMEM((S * B_PAD, 8 * HID), jnp.float32),   # pre_buf
                        pltpu.VMEM((S * B_PAD, 2 * HID), jnp.float32)],  # x1_buf
    )(tok, fused["emb_proj"], fused["wrec0"],
      fused["wih1"], fused["b1"], fused["wrec1"],
      fused["linear_w"], fused["linear_b"])
    return out_pad[:B]


# ----------------------- pure-JAX reference (for checking) -------------------
def ref_direction(x, w_ih, w_hh, b):
    S, B, _ = x.shape
    H = w_hh.shape[0]
    h = jnp.zeros((B, H), jnp.float32)
    c = jnp.zeros((B, H), jnp.float32)
    outs = []
    for t in range(S):
        gates = x[t] @ w_ih + h @ w_hh + b
        i = jax.nn.sigmoid(gates[:, 0 * H:1 * H])
        f = jax.nn.sigmoid(gates[:, 1 * H:2 * H])
        g = jnp.tanh(gates[:, 2 * H:3 * H])
        o = jax.nn.sigmoid(gates[:, 3 * H:4 * H])
        c = f * c + i * g
        h = o * jnp.tanh(c)
        outs.append(h)
    return jnp.stack(outs, axis=0)


def ref_forward(text, params):
    x = jnp.take(params["embedding"], text, axis=0)
    h_f_last = h_b_last = None
    for layer in range(N_LAYERS):
        pf = params["layers"][layer]["fwd"]
        pb = params["layers"][layer]["bwd"]
        out_f = ref_direction(x, *pf)
        out_b_rev = ref_direction(x[::-1], *pb)
        out_b = out_b_rev[::-1]
        h_f_last = out_f[-1]
        h_b_last = out_b_rev[-1]
        x = jnp.concatenate([out_f, out_b], axis=-1)
    hidden_cat = jnp.concatenate([h_f_last, h_b_last], axis=-1)
    return hidden_cat @ params["linear_w"] + params["linear_b"]


# ------------------------------ param init -----------------------------------
def init_params(key):
    keys = jax.random.split(key, 64)
    ki = iter(range(64))

    emb = jax.random.normal(keys[next(ki)], (VOCAB, EMB), jnp.float32) * 0.1
    emb = emb.at[PAD_IDX].set(0.0)     # padding_idx row is zero

    layers = []
    for layer in range(N_LAYERS):
        in_size = EMB if layer == 0 else 2 * HID
        layer_p = {}
        for d in ("fwd", "bwd"):
            w_ih = jax.random.normal(keys[next(ki)], (in_size, 4 * HID), jnp.float32) * 0.1
            w_hh = jax.random.normal(keys[next(ki)], (HID, 4 * HID), jnp.float32) * 0.1
            b = jax.random.normal(keys[next(ki)], (1, 4 * HID), jnp.float32) * 0.1
            layer_p[d] = (w_ih, w_hh, b)
        layers.append(layer_p)

    linear_w = jax.random.normal(keys[next(ki)], (2 * HID, OUT), jnp.float32) * 0.1
    linear_b = jax.random.normal(keys[next(ki)], (1, OUT), jnp.float32) * 0.1

    return {"embedding": emb, "layers": layers,
            "linear_w": linear_w, "linear_b": linear_b}


# --------------------------------- main ---------------------------------------
if __name__ == "__main__":
    key = jax.random.PRNGKey(0)
    pkey, tkey = jax.random.split(key)
    params = init_params(pkey)
    fused = fuse_params(params)

    # text: (seq_len, batch) int32 token ids
    text = jax.random.randint(tkey, (SEQ, BATCH), 0, VOCAB, dtype=jnp.int32)

    out = lstm_model_forward(text, fused)
    out = jax.block_until_ready(out)
    assert out.shape == (BATCH, OUT), out.shape

    ref = ref_forward(text, params)
    assert jnp.allclose(out, ref, rtol=2e-2, atol=2e-2), (out, ref)

    print("KERNEL_OK")
</pallas_src>

<mosaic_0001>
module attributes {stable_mosaic.version = 11 : i64} {
  func.func @fused_lstm_kernel(%arg0: memref<64x1xi32, #tpu.memory_space<vmem>>, %arg1: memref<64x256xbf16, #tpu.memory_space<vmem>>, %arg2: memref<32x256xbf16, #tpu.memory_space<vmem>>, %arg3: memref<64x256xbf16, #tpu.memory_space<vmem>>, %arg4: memref<1x256xf32, #tpu.memory_space<vmem>>, %arg5: memref<32x256xbf16, #tpu.memory_space<vmem>>, %arg6: memref<64x4xf32, #tpu.memory_space<vmem>>, %arg7: memref<1x4xf32, #tpu.memory_space<vmem>>, %arg8: memref<8x4xf32, #tpu.memory_space<vmem>>, %arg9: memref<64x256xf32, #tpu.memory_space<vmem>>, %arg10: memref<64x64xf32, #tpu.memory_space<vmem>>) attributes {dimension_semantics = [], scalar_prefetch = 0 : i64, scratch_operands = 2 : i64, tpu.core_type = #tpu.core_type<tc>} {
    %0 = tpu.iota {dimensions = array<i32: 1>} : vector<16x128xi32>
    %c64_i32 = arith.constant 64 : i32
    %1 = vector.broadcast %c64_i32 : i32 to vector<16x128xi32>
    %2 = arith.cmpi sge, %0, %1 : vector<16x128xi32>
    %c96_i32 = arith.constant 96 : i32
    %3 = vector.broadcast %c96_i32 : i32 to vector<16x128xi32>
    %4 = arith.cmpi slt, %0, %3 : vector<16x128xi32>
    %5 = arith.andi %2, %4 : vector<16x128xi1>
    %c0 = arith.constant 0 : index
    %c0_0 = arith.constant 0 : index
    %6 = vector.load %arg0[%c0, %c0_0] : memref<64x1xi32, #tpu.memory_space<vmem>>, vector<64x1xi32>
    %7 = tpu.iota {dimensions = array<i32: 1>} : vector<64x64xi32>
    %8 = vector.broadcast %6 : vector<64x1xi32> to vector<64x64xi32>
    %9 = arith.cmpi eq, %7, %8 : vector<64x64xi32>
    %cst = arith.constant 1.000000e+00 : f32
    %cst_1 = arith.constant 0.000000e+00 : f32
    %10 = vector.broadcast %cst : f32 to vector<64x64xf32>
    %11 = vector.broadcast %cst_1 : f32 to vector<64x64xf32>
    %12 = arith.select %9, %10, %11 : vector<64x64xi1>, vector<64x64xf32>
    %13 = arith.truncf %12 : vector<64x64xf32> to vector<64x64xbf16>
    %c0_2 = arith.constant 0 : index
    %c0_3 = arith.constant 0 : index
    %14 = vector.load %arg1[%c0_2, %c0_3] : memref<64x256xbf16, #tpu.memory_space<vmem>>, vector<64x256xbf16>
    %cst_4 = arith.constant dense<0.000000e+00> : vector<64x256xf32>
    %15 = tpu.matmul %13, %14, %cst_4 {dimension_numbers = #tpu.dot_dimension_numbers<[1], [0], [0], [1], [0, 0, 1, 1], [], []>} : vector<64x64xbf16>, vector<64x256xbf16>, vector<64x256xf32> -> vector<64x256xf32>
    %c0_5 = arith.constant 0 : index
    %c0_6 = arith.constant 0 : index
    %16 = vector.load %arg9[%c0_5, %c0_6] : memref<64x256xf32, #tpu.memory_space<vmem>>, vector<64x256xf32>
    tpu.vector_store %arg9[%c0_5, %c0_6], %15 {strides = array<i32>} : memref<64x256xf32, #tpu.memory_space<vmem>>, vector<64x256xf32>,
    %c0_7 = arith.constant 0 : index
    %c0_8 = arith.constant 0 : index
    %17 = vector.load %arg2[%c0_7, %c0_8] : memref<32x256xbf16, #tpu.memory_space<vmem>>, vector<32x256xbf16>
    %cst_9 = arith.constant 0.000000e+00 : f32
    %18 = vector.broadcast %cst_9 : f32 to vector<16x32xf32>
    %cst_10 = arith.constant 0.000000e+00 : f32
    %19 = vector.broadcast %cst_10 : f32 to vector<16x32xf32>
    %20 = arith.truncf %18 : vector<16x32xf32> to vector<16x32xbf16>
    %cst_11 = arith.constant dense<0.000000e+00> : vector<16x256xf32>
    %21 = tpu.matmul %20, %17, %cst_11 {dimension_numbers = #tpu.dot_dimension_numbers<[1], [0], [0], [1], [0, 0, 1, 1], [], []>} : vector<16x32xbf16>, vector<32x256xbf16>, vector<16x256xf32> -> vector<16x256xf32>
    %c0_12 = arith.constant 0 : index
    %c0_13 = arith.constant 0 : index
    %22 = vector.load %arg9[%c0_12, %c0_13] : memref<64x256xf32, #tpu.memory_space<vmem>>, vector<8x128xf32>
    %23 = vector.extract_strided_slice %21 {offsets = [0, 0], sizes = [8, 128], strides = [1, 1]} : vector<16x256xf32> to vector<8x128xf32>
    %24 = arith.addf %22, %23 : vector<8x128xf32>
    %c56 = arith.constant 56 : index
    %c128 = arith.constant 128 : index
    %25 = vector.load %arg9[%c56, %c128] : memref<64x256xf32, #tpu.memory_space<vmem>>, vector<8x128xf32>
    %26 = vector.extract_strided_slice %21 {offsets = [8, 128], sizes = [8, 128], strides = [1, 1]} : vector<16x256xf32> to vector<8x128xf32>
    %27 = arith.addf %25, %26 : vector<8x128xf32>
    %28 = tpu.concatenate %24, %27 in 0 : vector<8x128xf32>, vector<8x128xf32> -> vector<16x128xf32>
    %cst_14 = arith.constant 5.000000e-01 : f32
    %29 = vector.broadcast %cst_14 : f32 to vector<16x128xf32>
    %30 = arith.mulf %29, %28 : vector<16x128xf32>
    %31 = arith.select %5, %28, %30 : vector<16x128xi1>, vector<16x128xf32>
    %32 = math.tanh %31 : vector<16x128xf32>
    %cst_15 = arith.constant 5.000000e-01 : f32
    %33 = vector.broadcast %cst_15 : f32 to vector<16x128xf32>
    %34 = arith.mulf %33, %32 : vector<16x128xf32>
    %cst_16 = arith.constant 5.000000e-01 : f32
    %35 = vector.broadcast %cst_16 : f32 to vector<16x128xf32>
    %36 = arith.addf %34, %35 : vector<16x128xf32>
    %37 = arith.select %5, %32, %36 : vector<16x128xi1>, vector<16x128xf32>
    %38 = vector.extract_strided_slice %37 {offsets = [0, 0], sizes = [16, 32], strides = [1, 1]} : vector<16x128xf32> to vector<16x32xf32>
    %39 = vector.extract_strided_slice %37 {offsets = [0, 32], sizes = [16, 32], strides = [1, 1]} : vector<16x128xf32> to vector<16x32xf32>
    %40 = vector.extract_strided_slice %37 {offsets = [0, 64], sizes = [16, 32], strides = [1, 1]} : vector<16x128xf32> to vector<16x32xf32>
    %41 = vector.extract_strided_slice %37 {offsets = [0, 96], sizes = [16, 32], strides = [1, 1]} : vector<16x128xf32> to vector<16x32xf32>
    %42 = arith.mulf %39, %19 : vector<16x32xf32>
    %43 = arith.mulf %38, %40 : vector<16x32xf32>
    %44 = arith.addf %42, %43 : vector<16x32xf32>
    %45 = math.tanh %44 : vector<16x32xf32>
    %46 = arith.mulf %41, %45 : vector<16x32xf32>
    %47 = vector.extract_strided_slice %46 {offsets = [0, 0], sizes = [8, 32], strides = [1, 1]} : vector<16x32xf32> to vector<8x32xf32>
    %c0_17 = arith.constant 0 : index
    %c0_18 = arith.constant 0 : index
    %48 = vector.load %arg10[%c0_17, %c0_18] : memref<64x64xf32, #tpu.memory_space<vmem>>, vector<8x32xf32>
    tpu.vector_store %arg10[%c0_17, %c0_18], %47 {strides = array<i32>} : memref<64x64xf32, #tpu.memory_space<vmem>>, vector<8x32xf32>,
    %49 = vector.extract_strided_slice %46 {offsets = [8, 0], sizes = [8, 32], strides = [1, 1]} : vector<16x32xf32> to vector<8x32xf32>
    %c56_19 = arith.constant 56 : index
    %c32 = arith.constant 32 : index
    %50 = vector.load %arg10[%c56_19, %c32] : memref<64x64xf32, #tpu.memory_space<vmem>>, vector<8x32xf32>
    tpu.vector_store %arg10[%c56_19, %c32], %49 {strides = array<i32>} : memref<64x64xf32, #tpu.memory_space<vmem>>, vector<8x32xf32>,
    %51 = arith.truncf %46 : vector<16x32xf32> to vector<16x32xbf16>
    %cst_20 = arith.constant dense<0.000000e+00> : vector<16x256xf32>
    %52 = tpu.matmul %51, %17, %cst_20 {dimension_numbers = #tpu.dot_dimension_numbers<[1], [0], [0], [1], [0, 0, 1, 1], [], []>} : vector<16x32xbf16>, vector<32x256xbf16>, vector<16x256xf32> -> vector<16x256xf32>
    %c8 = arith.constant 8 : index
    %c0_21 = arith.constant 0 : index
    %53 = vector.load %arg9[%c8, %c0_21] : memref<64x256xf32, #tpu.memory_space<vmem>>, vector<8x128xf32>
    %54 = vector.extract_strided_slice %52 {offsets = [0, 0], sizes = [8, 128], strides = [1, 1]} : vector<16x256xf32> to vector<8x128xf32>
    %55 = arith.addf %53, %54 : vector<8x128xf32>
    %c48 = arith.constant 48 : index
    %c128_22 = arith.constant 128 : index
    %56 = vector.load %arg9[%c48, %c128_22] : memref<64x256xf32, #tpu.memory_space<vmem>>, vector<8x128xf32>
    %57 = vector.extract_strided_slice %52 {offsets = [8, 128], sizes = [8, 128], strides = [1, 1]} : vector<16x256xf32> to vector<8x128xf32>
    %58 = arith.addf %56, %57 : vector<8x128xf32>
    %59 = tpu.concatenate %55, %58 in 0 : vector<8x128xf32>, vector<8x128xf32> -> vector<16x128xf32>
    %cst_23 = arith.constant 5.000000e-01 : f32
    %60 = vector.broadcast %cst_23 : f32 to vector<16x128xf32>
    %61 = arith.mulf %60, %59 : vector<16x128xf32>
    %62 = arith.select %5, %59, %61 : vector<16x128xi1>, vector<16x128xf32>
    %63 = math.tanh %62 : vector<16x128xf32>
    %cst_24 = arith.constant 5.000000e-01 : f32
    %64 = vector.broadcast %cst_24 : f32 to vector<16x128xf32>
    %65 = arith.mulf %64, %63 : vector<16x128xf32>
    %cst_25 = arith.constant 5.000000e-01 : f32
    %66 = vector.broadcast %cst_25 : f32 to vector<16x128xf32>
    %67 = arith.addf %65, %66 : vector<16x128xf32>
    %68 = arith.select %5, %63, %67 : vector<16x128xi1>, vector<16x128xf32>
    %69 = vector.extract_strided_slice %68 {offsets = [0, 0], sizes = [16, 32], strides = [1, 1]} : vector<16x128xf32> to vector<16x32xf32>
    %70 = vector.extract_strided_slice %68 {offsets = [0, 32], sizes = [16, 32], strides = [1, 1]} : vector<16x128xf32> to vector<16x32xf32>
    %71 = vector.extract_strided_slice %68 {offsets = [0, 64], sizes = [16, 32], strides = [1, 1]} : vector<16x128xf32> to vector<16x32xf32>
    %72 = vector.extract_strided_slice %68 {offsets = [0, 96], sizes = [16, 32], strides = [1, 1]} : vector<16x128xf32> to vector<16x32xf32>
    %73 = arith.mulf %70, %44 : vector<16x32xf32>
    %74 = arith.mulf %69, %71 : vector<16x32xf32>
    %75 = arith.addf %73, %74 : vector<16x32xf32>
    %76 = math.tanh %75 : vector<16x32xf32>
    %77 = arith.mulf %72, %76 : vector<16x32xf32>
    %78 = vector.extract_strided_slice %77 {offsets = [0, 0], sizes = [8, 32], strides = [1, 1]} : vector<16x32xf32> to vector<8x32xf32>
    %c8_26 = arith.constant 8 : index
    %c0_27 = arith.constant 0 : index
    %79 = vector.load %arg10[%c8_26, %c0_27] : memref<64x64xf32, #tpu.memory_space<vmem>>, vector<8x32xf32>
    tpu.vector_store %arg10[%c8_26, %c0_27], %78 {strides = array<i32>} : memref<64x64xf32, #tpu.memory_space<vmem>>, vector<8x32xf32>,
    %80 = vector.extract_strided_slice %77 {offsets = [8, 0], sizes = [8, 32], strides = [1, 1]} : vector<16x32xf32> to vector<8x32xf32>
    %c48_28 = arith.constant 48 : index
    %c32_29 = arith.constant 32 : index
    %81 = vector.load %arg10[%c48_28, %c32_29] : memref<64x64xf32, #tpu.memory_space<vmem>>, vector<8x32xf32>
    tpu.vector_store %arg10[%c48_28, %c32_29], %80 {strides = array<i32>} : memref<64x64xf32, #tpu.memory_space<vmem>>, vector<8x32xf32>,
    %82 = arith.truncf %77 : vector<16x32xf32> to vector<16x32xbf16>
    %cst_30 = arith.constant dense<0.000000e+00> : vector<16x256xf32>
    %83 = tpu.matmul %82, %17, %cst_30 {dimension_numbers = #tpu.dot_dimension_numbers<[1], [0], [0], [1], [0, 0, 1, 1], [], []>} : vector<16x32xbf16>, vector<32x256xbf16>, vector<16x256xf32> -> vector<16x256xf32>
    %c16 = arith.constant 16 : index
    %c0_31 = arith.constant 0 : index
    %84 = vector.load %arg9[%c16, %c0_31] : memref<64x256xf32, #tpu.memory_space<vmem>>, vector<8x128xf32>
    %85 = vector.extract_strided_slice %83 {offsets = [0, 0], sizes = [8, 128], strides = [1, 1]} : vector<16x256xf32> to vector<8x128xf32>
    %86 = arith.addf %84, %85 : vector<8x128xf32>
    %c40 = arith.constant 40 : index
    %c128_32 = arith.constant 128 : index
    %87 = vector.load %arg9[%c40, %c128_32] : memref<64x256xf32, #tpu.memory_space<vmem>>, vector<8x128xf32>
    %88 = vector.extract_strided_slice %83 {offsets = [8, 128], sizes = [8, 128], strides = [1, 1]} : vector<16x256xf32> to vector<8x128xf32>
    %89 = arith.addf %87, %88 : vector<8x128xf32>
    %90 = tpu.concatenate %86, %89 in 0 : vector<8x128xf32>, vector<8x128xf32> -> vector<16x128xf32>
    %cst_33 = arith.constant 5.000000e-01 : f32
    %91 = vector.broadcast %cst_33 : f32 to vector<16x128xf32>
    %92 = arith.mulf %91, %90 : vector<16x128xf32>
    %93 = arith.select %5, %90, %92 : vector<16x128xi1>, vector<16x128xf32>
    %94 = math.tanh %93 : vector<16x128xf32>
    %cst_34 = arith.constant 5.000000e-01 : f32
    %95 = vector.broadcast %cst_34 : f32 to vector<16x128xf32>
    %96 = arith.mulf %95, %94 : vector<16x128xf32>
    %cst_35 = arith.constant 5.000000e-01 : f32
    %97 = vector.broadcast %cst_35 : f32 to vector<16x128xf32>
    %98 = arith.addf %96, %97 : vector<16x128xf32>
    %99 = arith.select %5, %94, %98 : vector<16x128xi1>, vector<16x128xf32>
    %100 = vector.extract_strided_slice %99 {offsets = [0, 0], sizes = [16, 32], strides = [1, 1]} : vector<16x128xf32> to vector<16x32xf32>
    %101 = vector.extract_strided_slice %99 {offsets = [0, 32], sizes = [16, 32], strides = [1, 1]} : vector<16x128xf32> to vector<16x32xf32>
    %102 = vector.extract_strided_slice %99 {offsets = [0, 64], sizes = [16, 32], strides = [1, 1]} : vector<16x128xf32> to vector<16x32xf32>
    %103 = vector.extract_strided_slice %99 {offsets = [0, 96], sizes = [16, 32], strides = [1, 1]} : vector<16x128xf32> to vector<16x32xf32>
    %104 = arith.mulf %101, %75 : vector<16x32xf32>
    %105 = arith.mulf %100, %102 : vector<16x32xf32>
    %106 = arith.addf %104, %105 : vector<16x32xf32>
    %107 = math.tanh %106 : vector<16x32xf32>
    %108 = arith.mulf %103, %107 : vector<16x32xf32>
    %109 = vector.extract_strided_slice %108 {offsets = [0, 0], sizes = [8, 32], strides = [1, 1]} : vector<16x32xf32> to vector<8x32xf32>
    %c16_36 = arith.constant 16 : index
    %c0_37 = arith.constant 0 : index
    %110 = vector.load %arg10[%c16_36, %c0_37] : memref<64x64xf32, #tpu.memory_space<vmem>>, vector<8x32xf32>
    tpu.vector_store %arg10[%c16_36, %c0_37], %109 {strides = array<i32>} : memref<64x64xf32, #tpu.memory_space<vmem>>, vector<8x32xf32>,
    %111 = vector.extract_strided_slice %108 {offsets = [8, 0], sizes = [8, 32], strides = [1, 1]} : vector<16x32xf32> to vector<8x32xf32>
    %c40_38 = arith.constant 40 : index
    %c32_39 = arith.constant 32 : index
    %112 = vector.load %arg10[%c40_38, %c32_39] : memref<64x64xf32, #tpu.memory_space<vmem>>, vector<8x32xf32>
    tpu.vector_store %arg10[%c40_38, %c32_39], %111 {strides = array<i32>} : memref<64x64xf32, #tpu.memory_space<vmem>>, vector<8x32xf32>,
    %113 = arith.truncf %108 : vector<16x32xf32> to vector<16x32xbf16>
    %cst_40 = arith.constant dense<0.000000e+00> : vector<16x256xf32>
    %114 = tpu.matmul %113, %17, %cst_40 {dimension_numbers = #tpu.dot_dimension_numbers<[1], [0], [0], [1], [0, 0, 1, 1], [], []>} : vector<16x32xbf16>, vector<32x256xbf16>, vector<16x256xf32> -> vector<16x256xf32>
    %c24 = arith.constant 24 : index
    %c0_41 = arith.constant 0 : index
    %115 = vector.load %arg9[%c24, %c0_41] : memref<64x256xf32, #tpu.memory_space<vmem>>, vector<8x128xf32>
    %116 = vector.extract_strided_slice %114 {offsets = [0, 0], sizes = [8, 128], strides = [1, 1]} : vector<16x256xf32> to vector<8x128xf32>
    %117 = arith.addf %115, %116 : vector<8x128xf32>
    %c32_42 = arith.constant 32 : index
    %c128_43 = arith.constant 128 : index
    %118 = vector.load %arg9[%c32_42, %c128_43] : memref<64x256xf32, #tpu.memory_space<vmem>>, vector<8x128xf32>
    %119 = vector.extract_strided_slice %114 {offsets = [8, 128], sizes = [8, 128], strides = [1, 1]} : vector<16x256xf32> to vector<8x128xf32>
    %120 = arith.addf %118, %119 : vector<8x128xf32>
    %121 = tpu.concatenate %117, %120 in 0 : vector<8x128xf32>, vector<8x128xf32> -> vector<16x128xf32>
    %cst_44 = arith.constant 5.000000e-01 : f32
    %122 = vector.broadcast %cst_44 : f32 to vector<16x128xf32>
    %123 = arith.mulf %122, %121 : vector<16x128xf32>
    %124 = arith.select %5, %121, %123 : vector<16x128xi1>, vector<16x128xf32>
    %125 = math.tanh %124 : vector<16x128xf32>
    %cst_45 = arith.constant 5.000000e-01 : f32
    %126 = vector.broadcast %cst_45 : f32 to vector<16x128xf32>
    %127 = arith.mulf %126, %125 : vector<16x128xf32>
    %cst_46 = arith.constant 5.000000e-01 : f32
    %128 = vector.broadcast %cst_46 : f32 to vector<16x128xf32>
    %129 = arith.addf %127, %128 : vector<16x128xf32>
    %130 = arith.select %5, %125, %129 : vector<16x128xi1>, vector<16x128xf32>
    %131 = vector.extract_strided_slice %130 {offsets = [0, 0], sizes = [16, 32], strides = [1, 1]} : vector<16x128xf32> to vector<16x32xf32>
    %132 = vector.extract_strided_slice %130 {offsets = [0, 32], sizes = [16, 32], strides = [1, 1]} : vector<16x128xf32> to vector<16x32xf32>
    %133 = vector.extract_strided_slice %130 {offsets = [0, 64], sizes = [16, 32], strides = [1, 1]} : vector<16x128xf32> to vector<16x32xf32>
    %134 = vector.extract_strided_slice %130 {offsets = [0, 96], sizes = [16, 32], strides = [1, 1]} : vector<16x128xf32> to vector<16x32xf32>
    %135 = arith.mulf %132, %106 : vector<16x32xf32>
    %136 = arith.mulf %131, %133 : vector<16x32xf32>
    %137 = arith.addf %135, %136 : vector<16x32xf32>
    %138 = math.tanh %137 : vector<16x32xf32>
    %139 = arith.mulf %134, %138 : vector<16x32xf32>
    %140 = vector.extract_strided_slice %139 {offsets = [0, 0], sizes = [8, 32], strides = [1, 1]} : vector<16x32xf32> to vector<8x32xf32>
    %c24_47 = arith.constant 24 : index
    %c0_48 = arith.constant 0 : index
    %141 = vector.load %arg10[%c24_47, %c0_48] : memref<64x64xf32, #tpu.memory_space<vmem>>, vector<8x32xf32>
    tpu.vector_store %arg10[%c24_47, %c0_48], %140 {strides = array<i32>} : memref<64x64xf32, #tpu.memory_space<vmem>>, vector<8x32xf32>,
    %142 = vector.extract_strided_slice %139 {offsets = [8, 0], sizes = [8, 32], strides = [1, 1]} : vector<16x32xf32> to vector<8x32xf32>
    %c32_49 = arith.constant 32 : index
    %c32_50 = arith.constant 32 : index
    %143 = vector.load %arg10[%c32_49, %c32_50] : memref<64x64xf32, #tpu.memory_space<vmem>>, vector<8x32xf32>
    tpu.vector_store %arg10[%c32_49, %c32_50], %142 {strides = array<i32>} : memref<64x64xf32, #tpu.memory_space<vmem>>, vector<8x32xf32>,
    %144 = arith.truncf %139 : vector<16x32xf32> to vector<16x32xbf16>
    %cst_51 = arith.constant dense<0.000000e+00> : vector<16x256xf32>
    %145 = tpu.matmul %144, %17, %cst_51 {dimension_numbers = #tpu.dot_dimension_numbers<[1], [0], [0], [1], [0, 0, 1, 1], [], []>} : vector<16x32xbf16>, vector<32x256xbf16>, vector<16x256xf32> -> vector<16x256xf32>
    %c32_52 = arith.constant 32 : index
    %c0_53 = arith.constant 0 : index
    %146 = vector.load %arg9[%c32_52, %c0_53] : memref<64x256xf32, #tpu.memory_space<vmem>>, vector<8x128xf32>
    %147 = vector.extract_strided_slice %145 {offsets = [0, 0], sizes = [8, 128], strides = [1, 1]} : vector<16x256xf32> to vector<8x128xf32>
    %148 = arith.addf %146, %147 : vector<8x128xf32>
    %c24_54 = arith.constant 24 : index
    %c128_55 = arith.constant 128 : index
    %149 = vector.load %arg9[%c24_54, %c128_55] : memref<64x256xf32, #tpu.memory_space<vmem>>, vector<8x128xf32>
    %150 = vector.extract_strided_slice %145 {offsets = [8, 128], sizes = [8, 128], strides = [1, 1]} : vector<16x256xf32> to vector<8x128xf32>
    %151 = arith.addf %149, %150 : vector<8x128xf32>
    %152 = tpu.concatenate %148, %151 in 0 : vector<8x128xf32>, vector<8x128xf32> -> vector<16x128xf32>
    %cst_56 = arith.constant 5.000000e-01 : f32
    %153 = vector.broadcast %cst_56 : f32 to vector<16x128xf32>
    %154 = arith.mulf %153, %152 : vector<16x128xf32>
    %155 = arith.select %5, %152, %154 : vector<16x128xi1>, vector<16x128xf32>
    %156 = math.tanh %155 : vector<16x128xf32>
    %cst_57 = arith.constant 5.000000e-01 : f32
    %157 = vector.broadcast %cst_57 : f32 to vector<16x128xf32>
    %158 = arith.mulf %157, %156 : vector<16x128xf32>
    %cst_58 = arith.constant 5.000000e-01 : f32
    %159 = vector.broadcast %cst_58 : f32 to vector<16x128xf32>
    %160 = arith.addf %158, %159 : vector<16x128xf32>
    %161 = arith.select %5, %156, %160 : vector<16x128xi1>, vector<16x128xf32>
    %162 = vector.extract_strided_slice %161 {offsets = [0, 0], sizes = [16, 32], strides = [1, 1]} : vector<16x128xf32> to vector<16x32xf32>
    %163 = vector.extract_strided_slice %161 {offsets = [0, 32], sizes = [16, 32], strides = [1, 1]} : vector<16x128xf32> to vector<16x32xf32>
    %164 = vector.extract_strided_slice %161 {offsets = [0, 64], sizes = [16, 32], strides = [1, 1]} : vector<16x128xf32> to vector<16x32xf32>
    %165 = vector.extract_strided_slice %161 {offsets = [0, 96], sizes = [16, 32], strides = [1, 1]} : vector<16x128xf32> to vector<16x32xf32>
    %166 = arith.mulf %163, %137 : vector<16x32xf32>
    %167 = arith.mulf %162, %164 : vector<16x32xf32>
    %168 = arith.addf %166, %167 : vector<16x32xf32>
    %169 = math.tanh %168 : vector<16x32xf32>
    %170 = arith.mulf %165, %169 : vector<16x32xf32>
    %171 = vector.extract_strided_slice %170 {offsets = [0, 0], sizes = [8, 32], strides = [1, 1]} : vector<16x32xf32> to vector<8x32xf32>
    %c32_59 = arith.constant 32 : index
    %c0_60 = arith.constant 0 : index
    %172 = vector.load %arg10[%c32_59, %c0_60] : memref<64x64xf32, #tpu.memory_space<vmem>>, vector<8x32xf32>
    tpu.vector_store %arg10[%c32_59, %c0_60], %171 {strides = array<i32>} : memref<64x64xf32, #tpu.memory_space<vmem>>, vector<8x32xf32>,
    %173 = vector.extract_strided_slice %170 {offsets = [8, 0], sizes = [8, 32], strides = [1, 1]} : vector<16x32xf32> to vector<8x32xf32>
    %c24_61 = arith.constant 24 : index
    %c32_62 = arith.constant 32 : index
    %174 = vector.load %arg10[%c24_61, %c32_62] : memref<64x64xf32, #tpu.memory_space<vmem>>, vector<8x32xf32>
    tpu.vector_store %arg10[%c24_61, %c32_62], %173 {strides = array<i32>} : memref<64x64xf32, #tpu.memory_space<vmem>>, vector<8x32xf32>,
    %175 = arith.truncf %170 : vector<16x32xf32> to vector<16x32xbf16>
    %cst_63 = arith.constant dense<0.000000e+00> : vector<16x256xf32>
    %176 = tpu.matmul %175, %17, %cst_63 {dimension_numbers = #tpu.dot_dimension_numbers<[1], [0], [0], [1], [0, 0, 1, 1], [], []>} : vector<16x32xbf16>, vector<32x256xbf16>, vector<16x256xf32> -> vector<16x256xf32>
    %c40_64 = arith.constant 40 : index
    %c0_65 = arith.constant 0 : index
    %177 = vector.load %arg9[%c40_64, %c0_65] : memref<64x256xf32, #tpu.memory_space<vmem>>, vector<8x128xf32>
    %178 = vector.extract_strided_slice %176 {offsets = [0, 0], sizes = [8, 128], strides = [1, 1]} : vector<16x256xf32> to vector<8x128xf32>
    %179 = arith.addf %177, %178 : vector<8x128xf32>
    %c16_66 = arith.constant 16 : index
    %c128_67 = arith.constant 128 : index
    %180 = vector.load %arg9[%c16_66, %c128_67] : memref<64x256xf32, #tpu.memory_space<vmem>>, vector<8x128xf32>
    %181 = vector.extract_strided_slice %176 {offsets = [8, 128], sizes = [8, 128], strides = [1, 1]} : vector<16x256xf32> to vector<8x128xf32>
    %182 = arith.addf %180, %181 : vector<8x128xf32>
    %183 = tpu.concatenate %179, %182 in 0 : vector<8x128xf32>, vector<8x128xf32> -> vector<16x128xf32>
    %cst_68 = arith.constant 5.000000e-01 : f32
    %184 = vector.broadcast %cst_68 : f32 to vector<16x128xf32>
    %185 = arith.mulf %184, %183 : vector<16x128xf32>
    %186 = arith.select %5, %183, %185 : vector<16x128xi1>, vector<16x128xf32>
    %187 = math.tanh %186 : vector<16x128xf32>
    %cst_69 = arith.constant 5.000000e-01 : f32
    %188 = vector.broadcast %cst_69 : f32 to vector<16x128xf32>
    %189 = arith.mulf %188, %187 : vector<16x128xf32>
    %cst_70 = arith.constant 5.000000e-01 : f32
    %190 = vector.broadcast %cst_70 : f32 to vector<16x128xf32>
    %191 = arith.addf %189, %190 : vector<16x128xf32>
    %192 = arith.select %5, %187, %191 : vector<16x128xi1>, vector<16x128xf32>
    %193 = vector.extract_strided_slice %192 {offsets = [0, 0], sizes = [16, 32], strides = [1, 1]} : vector<16x128xf32> to vector<16x32xf32>
    %194 = vector.extract_strided_slice %192 {offsets = [0, 32], sizes = [16, 32], strides = [1, 1]} : vector<16x128xf32> to vector<16x32xf32>
    %195 = vector.extract_strided_slice %192 {offsets = [0, 64], sizes = [16, 32], strides = [1, 1]} : vector<16x128xf32> to vector<16x32xf32>
    %196 = vector.extract_strided_slice %192 {offsets = [0, 96], sizes = [16, 32], strides = [1, 1]} : vector<16x128xf32> to vector<16x32xf32>
    %197 = arith.mulf %194, %168 : vector<16x32xf32>
    %198 = arith.mulf %193, %195 : vector<16x32xf32>
    %199 = arith.addf %197, %198 : vector<16x32xf32>
    %200 = math.tanh %199 : vector<16x32xf32>
    %201 = arith.mulf %196, %200 : vector<16x32xf32>
    %202 = vector.extract_strided_slice %201 {offsets = [0, 0], sizes = [8, 32], strides = [1, 1]} : vector<16x32xf32> to vector<8x32xf32>
    %c40_71 = arith.constant 40 : index
    %c0_72 = arith.constant 0 : index
    %203 = vector.load %arg10[%c40_71, %c0_72] : memref<64x64xf32, #tpu.memory_space<vmem>>, vector<8x32xf32>
    tpu.vector_store %arg10[%c40_71, %c0_72], %202 {strides = array<i32>} : memref<64x64xf32, #tpu.memory_space<vmem>>, vector<8x32xf32>,
    %204 = vector.extract_strided_slice %201 {offsets = [8, 0], sizes = [8, 32], strides = [1, 1]} : vector<16x32xf32> to vector<8x32xf32>
    %c16_73 = arith.constant 16 : index
    %c32_74 = arith.constant 32 : index
    %205 = vector.load %arg10[%c16_73, %c32_74] : memref<64x64xf32, #tpu.memory_space<vmem>>, vector<8x32xf32>
    tpu.vector_store %arg10[%c16_73, %c32_74], %204 {strides = array<i32>} : memref<64x64xf32, #tpu.memory_space<vmem>>, vector<8x32xf32>,
    %206 = arith.truncf %201 : vector<16x32xf32> to vector<16x32xbf16>
    %cst_75 = arith.constant dense<0.000000e+00> : vector<16x256xf32>
    %207 = tpu.matmul %206, %17, %cst_75 {dimension_numbers = #tpu.dot_dimension_numbers<[1], [0], [0], [1], [0, 0, 1, 1], [], []>} : vector<16x32xbf16>, vector<32x256xbf16>, vector<16x256xf32> -> vector<16x256xf32>
    %c48_76 = arith.constant 48 : index
    %c0_77 = arith.constant 0 : index
    %208 = vector.load %arg9[%c48_76, %c0_77] : memref<64x256xf32, #tpu.memory_space<vmem>>, vector<8x128xf32>
    %209 = vector.extract_strided_slice %207 {offsets = [0, 0], sizes = [8, 128], strides = [1, 1]} : vector<16x256xf32> to vector<8x128xf32>
    %210 = arith.addf %208, %209 : vector<8x128xf32>
    %c8_78 = arith.constant 8 : index
    %c128_79 = arith.constant 128 : index
    %211 = vector.load %arg9[%c8_78, %c128_79] : memref<64x256xf32, #tpu.memory_space<vmem>>, vector<8x128xf32>
    %212 = vector.extract_strided_slice %207 {offsets = [8, 128], sizes = [8, 128], strides = [1, 1]} : vector<16x256xf32> to vector<8x128xf32>
    %213 = arith.addf %211, %212 : vector<8x128xf32>
    %214 = tpu.concatenate %210, %213 in 0 : vector<8x128xf32>, vector<8x128xf32> -> vector<16x128xf32>
    %cst_80 = arith.constant 5.000000e-01 : f32
    %215 = vector.broadcast %cst_80 : f32 to vector<16x128xf32>
    %216 = arith.mulf %215, %214 : vector<16x128xf32>
    %217 = arith.select %5, %214, %216 : vector<16x128xi1>, vector<16x128xf32>
    %218 = math.tanh %217 : vector<16x128xf32>
    %cst_81 = arith.constant 5.000000e-01 : f32
    %219 = vector.broadcast %cst_81 : f32 to vector<16x128xf32>
    %220 = arith.mulf %219, %218 : vector<16x128xf32>
    %cst_82 = arith.constant 5.000000e-01 : f32
    %221 = vector.broadcast %cst_82 : f32 to vector<16x128xf32>
    %222 = arith.addf %220, %221 : vector<16x128xf32>
    %223 = arith.select %5, %218, %222 : vector<16x128xi1>, vector<16x128xf32>
    %224 = vector.extract_strided_slice %223 {offsets = [0, 0], sizes = [16, 32], strides = [1, 1]} : vector<16x128xf32> to vector<16x32xf32>
    %225 = vector.extract_strided_slice %223 {offsets = [0, 32], sizes = [16, 32], strides = [1, 1]} : vector<16x128xf32> to vector<16x32xf32>
    %226 = vector.extract_strided_slice %223 {offsets = [0, 64], sizes = [16, 32], strides = [1, 1]} : vector<16x128xf32> to vector<16x32xf32>
    %227 = vector.extract_strided_slice %223 {offsets = [0, 96], sizes = [16, 32], strides = [1, 1]} : vector<16x128xf32> to vector<16x32xf32>
    %228 = arith.mulf %225, %199 : vector<16x32xf32>
    %229 = arith.mulf %224, %226 : vector<16x32xf32>
    %230 = arith.addf %228, %229 : vector<16x32xf32>
    %231 = math.tanh %230 : vector<16x32xf32>
    %232 = arith.mulf %227, %231 : vector<16x32xf32>
    %233 = vector.extract_strided_slice %232 {offsets = [0, 0], sizes = [8, 32], strides = [1, 1]} : vector<16x32xf32> to vector<8x32xf32>
    %c48_83 = arith.constant 48 : index
    %c0_84 = arith.constant 0 : index
    %234 = vector.load %arg10[%c48_83, %c0_84] : memref<64x64xf32, #tpu.memory_space<vmem>>, vector<8x32xf32>
    tpu.vector_store %arg10[%c48_83, %c0_84], %233 {strides = array<i32>} : memref<64x64xf32, #tpu.memory_space<vmem>>, vector<8x32xf32>,
    %235 = vector.extract_strided_slice %232 {offsets = [8, 0], sizes = [8, 32], strides = [1, 1]} : vector<16x32xf32> to vector<8x32xf32>
    %c8_85 = arith.constant 8 : index
    %c32_86 = arith.constant 32 : index
    %236 = vector.load %arg10[%c8_85, %c32_86] : memref<64x64xf32, #tpu.memory_space<vmem>>, vector<8x32xf32>
    tpu.vector_store %arg10[%c8_85, %c32_86], %235 {strides = array<i32>} : memref<64x64xf32, #tpu.memory_space<vmem>>, vector<8x32xf32>,
    %237 = arith.truncf %232 : vector<16x32xf32> to vector<16x32xbf16>
    %cst_87 = arith.constant dense<0.000000e+00> : vector<16x256xf32>
    %238 = tpu.matmul %237, %17, %cst_87 {dimension_numbers = #tpu.dot_dimension_numbers<[1], [0], [0], [1], [0, 0, 1, 1], [], []>} : vector<16x32xbf16>, vector<32x256xbf16>, vector<16x256xf32> -> vector<16x256xf32>
    %c56_88 = arith.constant 56 : index
    %c0_89 = arith.constant 0 : index
    %239 = vector.load %arg9[%c56_88, %c0_89] : memref<64x256xf32, #tpu.memory_space<vmem>>, vector<8x128xf32>
    %240 = vector.extract_strided_slice %238 {offsets = [0, 0], sizes = [8, 128], strides = [1, 1]} : vector<16x256xf32> to vector<8x128xf32>
    %241 = arith.addf %239, %240 : vector<8x128xf32>
    %c0_90 = arith.constant 0 : index
    %c128_91 = arith.constant 128 : index
    %242 = vector.load %arg9[%c0_90, %c128_91] : memref<64x256xf32, #tpu.memory_space<vmem>>, vector<8x128xf32>
    %243 = vector.extract_strided_slice %238 {offsets = [8, 128], sizes = [8, 128], strides = [1, 1]} : vector<16x256xf32> to vector<8x128xf32>
    %244 = arith.addf %242, %243 : vector<8x128xf32>
    %245 = tpu.concatenate %241, %244 in 0 : vector<8x128xf32>, vector<8x128xf32> -> vector<16x128xf32>
    %cst_92 = arith.constant 5.000000e-01 : f32
    %246 = vector.broadcast %cst_92 : f32 to vector<16x128xf32>
    %247 = arith.mulf %246, %245 : vector<16x128xf32>
    %248 = arith.select %5, %245, %247 : vector<16x128xi1>, vector<16x128xf32>
    %249 = math.tanh %248 : vector<16x128xf32>
    %cst_93 = arith.constant 5.000000e-01 : f32
    %250 = vector.broadcast %cst_93 : f32 to vector<16x128xf32>
    %251 = arith.mulf %250, %249 : vector<16x128xf32>
    %cst_94 = arith.constant 5.000000e-01 : f32
    %252 = vector.broadcast %cst_94 : f32 to vector<16x128xf32>
    %253 = arith.addf %251, %252 : vector<16x128xf32>
    %254 = arith.select %5, %249, %253 : vector<16x128xi1>, vector<16x128xf32>
    %255 = vector.extract_strided_slice %254 {offsets = [0, 0], sizes = [16, 32], strides = [1, 1]} : vector<16x128xf32> to vector<16x32xf32>
    %256 = vector.extract_strided_slice %254 {offsets = [0, 32], sizes = [16, 32], strides = [1, 1]} : vector<16x128xf32> to vector<16x32xf32>
    %257 = vector.extract_strided_slice %254 {offsets = [0, 64], sizes = [16, 32], strides = [1, 1]} : vector<16x128xf32> to vector<16x32xf32>
    %258 = vector.extract_strided_slice %254 {offsets = [0, 96], sizes = [16, 32], strides = [1, 1]} : vector<16x128xf32> to vector<16x32xf32>
    %259 = arith.mulf %256, %230 : vector<16x32xf32>
    %260 = arith.mulf %255, %257 : vector<16x32xf32>
    %261 = arith.addf %259, %260 : vector<16x32xf32>
    %262 = math.tanh %261 : vector<16x32xf32>
    %263 = arith.mulf %258, %262 : vector<16x32xf32>
    %264 = vector.extract_strided_slice %263 {offsets = [0, 0], sizes = [8, 32], strides = [1, 1]} : vector<16x32xf32> to vector<8x32xf32>
    %c56_95 = arith.constant 56 : index
    %c0_96 = arith.constant 0 : index
    %265 = vector.load %arg10[%c56_95, %c0_96] : memref<64x64xf32, #tpu.memory_space<vmem>>, vector<8x32xf32>
    tpu.vector_store %arg10[%c56_95, %c0_96], %264 {strides = array<i32>} : memref<64x64xf32, #tpu.memory_space<vmem>>, vector<8x32xf32>,
    %266 = vector.extract_strided_slice %263 {offsets = [8, 0], sizes = [8, 32], strides = [1, 1]} : vector<16x32xf32> to vector<8x32xf32>
    %c0_97 = arith.constant 0 : index
    %c32_98 = arith.constant 32 : index
    %267 = vector.load %arg10[%c0_97, %c32_98] : memref<64x64xf32, #tpu.memory_space<vmem>>, vector<8x32xf32>
    tpu.vector_store %arg10[%c0_97, %c32_98], %266 {strides = array<i32>} : memref<64x64xf32, #tpu.memory_space<vmem>>, vector<8x32xf32>,
    %c0_99 = arith.constant 0 : index
    %c0_100 = arith.constant 0 : index
    %268 = vector.load %arg10[%c0_99, %c0_100] : memref<64x64xf32, #tpu.memory_space<vmem>>, vector<64x64xf32>
    %269 = arith.truncf %268 : vector<64x64xf32> to vector<64x64xbf16>
    %c0_101 = arith.constant 0 : index
    %c0_102 = arith.constant 0 : index
    %270 = vector.load %arg3[%c0_101, %c0_102] : memref<64x256xbf16, #tpu.memory_space<vmem>>, vector<64x256xbf16>
    %cst_103 = arith.constant dense<0.000000e+00> : vector<64x256xf32>
    %271 = tpu.matmul %269, %270, %cst_103 {dimension_numbers = #tpu.dot_dimension_numbers<[1], [0], [0], [1], [0, 0, 1, 1], [], []>} : vector<64x64xbf16>, vector<64x256xbf16>, vector<64x256xf32> -> vector<64x256xf32>
    %c0_104 = arith.constant 0 : index
    %c0_105 = arith.constant 0 : index
    %272 = vector.load %arg4[%c0_104, %c0_105] : memref<1x256xf32, #tpu.memory_space<vmem>>, vector<1x256xf32>
    %273 = vector.broadcast %272 : vector<1x256xf32> to vector<64x256xf32>
    %274 = arith.addf %271, %273 : vector<64x256xf32>
    %c0_106 = arith.constant 0 : index
    %c0_107 = arith.constant 0 : index
    %275 = vector.load %arg9[%c0_106, %c0_107] : memref<64x256xf32, #tpu.memory_space<vmem>>, vector<64x256xf32>
    tpu.vector_store %arg9[%c0_106, %c0_107], %274 {strides = array<i32>} : memref<64x256xf32, #tpu.memory_space<vmem>>, vector<64x256xf32>,
    %c0_108 = arith.constant 0 : index
    %c0_109 = arith.constant 0 : index
    %276 = vector.load %arg5[%c0_108, %c0_109] : memref<32x256xbf16, #tpu.memory_space<vmem>>, vector<32x256xbf16>
    %cst_110 = arith.constant 0.000000e+00 : f32
    %277 = vector.broadcast %cst_110 : f32 to vector<16x32xf32>
    %cst_111 = arith.constant 0.000000e+00 : f32
    %278 = vector.broadcast %cst_111 : f32 to vector<16x32xf32>
    %279 = arith.truncf %277 : vector<16x32xf32> to vector<16x32xbf16>
    %cst_112 = arith.constant dense<0.000000e+00> : vector<16x256xf32>
    %280 = tpu.matmul %279, %276, %cst_112 {dimension_numbers = #tpu.dot_dimension_numbers<[1], [0], [0], [1], [0, 0, 1, 1], [], []>} : vector<16x32xbf16>, vector<32x256xbf16>, vector<16x256xf32> -> vector<16x256xf32>
    %c0_113 = arith.constant 0 : index
    %c0_114 = arith.constant 0 : index
    %281 = vector.load %arg9[%c0_113, %c0_114] : memref<64x256xf32, #tpu.memory_space<vmem>>, vector<8x128xf32>
    %282 = vector.extract_strided_slice %280 {offsets = [0, 0], sizes = [8, 128], strides = [1, 1]} : vector<16x256xf32> to vector<8x128xf32>
    %283 = arith.addf %281, %282 : vector<8x128xf32>
    %c56_115 = arith.constant 56 : index
    %c128_116 = arith.constant 128 : index
    %284 = vector.load %arg9[%c56_115, %c128_116] : memref<64x256xf32, #tpu.memory_space<vmem>>, vector<8x128xf32>
    %285 = vector.extract_strided_slice %280 {offsets = [8, 128], sizes = [8, 128], strides = [1, 1]} : vector<16x256xf32> to vector<8x128xf32>
    %286 = arith.addf %284, %285 : vector<8x128xf32>
    %287 = tpu.concatenate %283, %286 in 0 : vector<8x128xf32>, vector<8x128xf32> -> vector<16x128xf32>
    %cst_117 = arith.constant 5.000000e-01 : f32
    %288 = vector.broadcast %cst_117 : f32 to vector<16x128xf32>
    %289 = arith.mulf %288, %287 : vector<16x128xf32>
    %290 = arith.select %5, %287, %289 : vector<16x128xi1>, vector<16x128xf32>
    %291 = math.tanh %290 : vector<16x128xf32>
    %cst_118 = arith.constant 5.000000e-01 : f32
    %292 = vector.broadcast %cst_118 : f32 to vector<16x128xf32>
    %293 = arith.mulf %292, %291 : vector<16x128xf32>
    %cst_119 = arith.constant 5.000000e-01 : f32
    %294 = vector.broadcast %cst_119 : f32 to vector<16x128xf32>
    %295 = arith.addf %293, %294 : vector<16x128xf32>
    %296 = arith.select %5, %291, %295 : vector<16x128xi1>, vector<16x128xf32>
    %297 = vector.extract_strided_slice %296 {offsets = [0, 0], sizes = [16, 32], strides = [1, 1]} : vector<16x128xf32> to vector<16x32xf32>
    %298 = vector.extract_strided_slice %296 {offsets = [0, 32], sizes = [16, 32], strides = [1, 1]} : vector<16x128xf32> to vector<16x32xf32>
    %299 = vector.extract_strided_slice %296 {offsets = [0, 64], sizes = [16, 32], strides = [1, 1]} : vector<16x128xf32> to vector<16x32xf32>
    %300 = vector.extract_strided_slice %296 {offsets = [0, 96], sizes = [16, 32], strides = [1, 1]} : vector<16x128xf32> to vector<16x32xf32>
    %301 = arith.mulf %298, %278 : vector<16x32xf32>
    %302 = arith.mulf %297, %299 : vector<16x32xf32>
    %303 = arith.addf %301, %302 : vector<16x32xf32>
    %304 = math.tanh %303 : vector<16x32xf32>
    %305 = arith.mulf %300, %304 : vector<16x32xf32>
    %306 = arith.truncf %305 : vector<16x32xf32> to vector<16x32xbf16>
    %cst_120 = arith.constant dense<0.000000e+00> : vector<16x256xf32>
    %307 = tpu.matmul %306, %276, %cst_120 {dimension_numbers = #tpu.dot_dimension_numbers<[1], [0], [0], [1], [0, 0, 1, 1], [], []>} : vector<16x32xbf16>, vector<32x256xbf16>, vector<16x256xf32> -> vector<16x256xf32>
    %c8_121 = arith.constant 8 : index
    %c0_122 = arith.constant 0 : index
    %308 = vector.load %arg9[%c8_121, %c0_122] : memref<64x256xf32, #tpu.memory_space<vmem>>, vector<8x128xf32>
    %309 = vector.extract_strided_slice %307 {offsets = [0, 0], sizes = [8, 128], strides = [1, 1]} : vector<16x256xf32> to vector<8x128xf32>
    %310 = arith.addf %308, %309 : vector<8x128xf32>
    %c48_123 = arith.constant 48 : index
    %c128_124 = arith.constant 128 : index
    %311 = vector.load %arg9[%c48_123, %c128_124] : memref<64x256xf32, #tpu.memory_space<vmem>>, vector<8x128xf32>
    %312 = vector.extract_strided_slice %307 {offsets = [8, 128], sizes = [8, 128], strides = [1, 1]} : vector<16x256xf32> to vector<8x128xf32>
    %313 = arith.addf %311, %312 : vector<8x128xf32>
    %314 = tpu.concatenate %310, %313 in 0 : vector<8x128xf32>, vector<8x128xf32> -> vector<16x128xf32>
    %cst_125 = arith.constant 5.000000e-01 : f32
    %315 = vector.broadcast %cst_125 : f32 to vector<16x128xf32>
    %316 = arith.mulf %315, %314 : vector<16x128xf32>
    %317 = arith.select %5, %314, %316 : vector<16x128xi1>, vector<16x128xf32>
    %318 = math.tanh %317 : vector<16x128xf32>
    %cst_126 = arith.constant 5.000000e-01 : f32
    %319 = vector.broadcast %cst_126 : f32 to vector<16x128xf32>
    %320 = arith.mulf %319, %318 : vector<16x128xf32>
    %cst_127 = arith.constant 5.000000e-01 : f32
    %321 = vector.broadcast %cst_127 : f32 to vector<16x128xf32>
    %322 = arith.addf %320, %321 : vector<16x128xf32>
    %323 = arith.select %5, %318, %322 : vector<16x128xi1>, vector<16x128xf32>
    %324 = vector.extract_strided_slice %323 {offsets = [0, 0], sizes = [16, 32], strides = [1, 1]} : vector<16x128xf32> to vector<16x32xf32>
    %325 = vector.extract_strided_slice %323 {offsets = [0, 32], sizes = [16, 32], strides = [1, 1]} : vector<16x128xf32> to vector<16x32xf32>
    %326 = vector.extract_strided_slice %323 {offsets = [0, 64], sizes = [16, 32], strides = [1, 1]} : vector<16x128xf32> to vector<16x32xf32>
    %327 = vector.extract_strided_slice %323 {offsets = [0, 96], sizes = [16, 32], strides = [1, 1]} : vector<16x128xf32> to vector<16x32xf32>
    %328 = arith.mulf %325, %303 : vector<16x32xf32>
    %329 = arith.mulf %324, %326 : vector<16x32xf32>
    %330 = arith.addf %328, %329 : vector<16x32xf32>
    %331 = math.tanh %330 : vector<16x32xf32>
    %332 = arith.mulf %327, %331 : vector<16x32xf32>
    %333 = arith.truncf %332 : vector<16x32xf32> to vector<16x32xbf16>
    %cst_128 = arith.constant dense<0.000000e+00> : vector<16x256xf32>
    %334 = tpu.matmul %333, %276, %cst_128 {dimension_numbers = #tpu.dot_dimension_numbers<[1], [0], [0], [1], [0, 0, 1, 1], [], []>} : vector<16x32xbf16>, vector<32x256xbf16>, vector<16x256xf32> -> vector<16x256xf32>
    %c16_129 = arith.constant 16 : index
    %c0_130 = arith.constant 0 : index
    %335 = vector.load %arg9[%c16_129, %c0_130] : memref<64x256xf32, #tpu.memory_space<vmem>>, vector<8x128xf32>
    %336 = vector.extract_strided_slice %334 {offsets = [0, 0], sizes = [8, 128], strides = [1, 1]} : vector<16x256xf32> to vector<8x128xf32>
    %337 = arith.addf %335, %336 : vector<8x128xf32>
    %c40_131 = arith.constant 40 : index
    %c128_132 = arith.constant 128 : index
    %338 = vector.load %arg9[%c40_131, %c128_132] : memref<64x256xf32, #tpu.memory_space<vmem>>, vector<8x128xf32>
    %339 = vector.extract_strided_slice %334 {offsets = [8, 128], sizes = [8, 128], strides = [1, 1]} : vector<16x256xf32> to vector<8x128xf32>
    %340 = arith.addf %338, %339 : vector<8x128xf32>
    %341 = tpu.concatenate %337, %340 in 0 : vector<8x128xf32>, vector<8x128xf32> -> vector<16x128xf32>
    %cst_133 = arith.constant 5.000000e-01 : f32
    %342 = vector.broadcast %cst_133 : f32 to vector<16x128xf32>
    %343 = arith.mulf %342, %341 : vector<16x128xf32>
    %344 = arith.select %5, %341, %343 : vector<16x128xi1>, vector<16x128xf32>
    %345 = math.tanh %344 : vector<16x128xf32>
    %cst_134 = arith.constant 5.000000e-01 : f32
    %346 = vector.broadcast %cst_134 : f32 to vector<16x128xf32>
    %347 = arith.mulf %346, %345 : vector<16x128xf32>
    %cst_135 = arith.constant 5.000000e-01 : f32
    %348 = vector.broadcast %cst_135 : f32 to vector<16x128xf32>
    %349 = arith.addf %347, %348 : vector<16x128xf32>
    %350 = arith.select %5, %345, %349 : vector<16x128xi1>, vector<16x128xf32>
    %351 = vector.extract_strided_slice %350 {offsets = [0, 0], sizes = [16, 32], strides = [1, 1]} : vector<16x128xf32> to vector<16x32xf32>
    %352 = vector.extract_strided_slice %350 {offsets = [0, 32], sizes = [16, 32], strides = [1, 1]} : vector<16x128xf32> to vector<16x32xf32>
    %353 = vector.extract_strided_slice %350 {offsets = [0, 64], sizes = [16, 32], strides = [1, 1]} : vector<16x128xf32> to vector<16x32xf32>
    %354 = vector.extract_strided_slice %350 {offsets = [0, 96], sizes = [16, 32], strides = [1, 1]} : vector<16x128xf32> to vector<16x32xf32>
    %355 = arith.mulf %352, %330 : vector<16x32xf32>
    %356 = arith.mulf %351, %353 : vector<16x32xf32>
    %357 = arith.addf %355, %356 : vector<16x32xf32>
    %358 = math.tanh %357 : vector<16x32xf32>
    %359 = arith.mulf %354, %358 : vector<16x32xf32>
    %360 = arith.truncf %359 : vector<16x32xf32> to vector<16x32xbf16>
    %cst_136 = arith.constant dense<0.000000e+00> : vector<16x256xf32>
    %361 = tpu.matmul %360, %276, %cst_136 {dimension_numbers = #tpu.dot_dimension_numbers<[1], [0], [0], [1], [0, 0, 1, 1], [], []>} : vector<16x32xbf16>, vector<32x256xbf16>, vector<16x256xf32> -> vector<16x256xf32>
    %c24_137 = arith.constant 24 : index
    %c0_138 = arith.constant 0 : index
    %362 = vector.load %arg9[%c24_137, %c0_138] : memref<64x256xf32, #tpu.memory_space<vmem>>, vector<8x128xf32>
    %363 = vector.extract_strided_slice %361 {offsets = [0, 0], sizes = [8, 128], strides = [1, 1]} : vector<16x256xf32> to vector<8x128xf32>
    %364 = arith.addf %362, %363 : vector<8x128xf32>
    %c32_139 = arith.constant 32 : index
    %c128_140 = arith.constant 128 : index
    %365 = vector.load %arg9[%c32_139, %c128_140] : memref<64x256xf32, #tpu.memory_space<vmem>>, vector<8x128xf32>
    %366 = vector.extract_strided_slice %361 {offsets = [8, 128], sizes = [8, 128], strides = [1, 1]} : vector<16x256xf32> to vector<8x128xf32>
    %367 = arith.addf %365, %366 : vector<8x128xf32>
    %368 = tpu.concatenate %364, %367 in 0 : vector<8x128xf32>, vector<8x128xf32> -> vector<16x128xf32>
    %cst_141 = arith.constant 5.000000e-01 : f32
    %369 = vector.broadcast %cst_141 : f32 to vector<16x128xf32>
    %370 = arith.mulf %369, %368 : vector<16x128xf32>
    %371 = arith.select %5, %368, %370 : vector<16x128xi1>, vector<16x128xf32>
    %372 = math.tanh %371 : vector<16x128xf32>
    %cst_142 = arith.constant 5.000000e-01 : f32
    %373 = vector.broadcast %cst_142 : f32 to vector<16x128xf32>
    %374 = arith.mulf %373, %372 : vector<16x128xf32>
    %cst_143 = arith.constant 5.000000e-01 : f32
    %375 = vector.broadcast %cst_143 : f32 to vector<16x128xf32>
    %376 = arith.addf %374, %375 : vector<16x128xf32>
    %377 = arith.select %5, %372, %376 : vector<16x128xi1>, vector<16x128xf32>
    %378 = vector.extract_strided_slice %377 {offsets = [0, 0], sizes = [16, 32], strides = [1, 1]} : vector<16x128xf32> to vector<16x32xf32>
    %379 = vector.extract_strided_slice %377 {offsets = [0, 32], sizes = [16, 32], strides = [1, 1]} : vector<16x128xf32> to vector<16x32xf32>
    %380 = vector.extract_strided_slice %377 {offsets = [0, 64], sizes = [16, 32], strides = [1, 1]} : vector<16x128xf32> to vector<16x32xf32>
    %381 = vector.extract_strided_slice %377 {offsets = [0, 96], sizes = [16, 32], strides = [1, 1]} : vector<16x128xf32> to vector<16x32xf32>
    %382 = arith.mulf %379, %357 : vector<16x32xf32>
    %383 = arith.mulf %378, %380 : vector<16x32xf32>
    %384 = arith.addf %382, %383 : vector<16x32xf32>
    %385 = math.tanh %384 : vector<16x32xf32>
    %386 = arith.mulf %381, %385 : vector<16x32xf32>
    %387 = arith.truncf %386 : vector<16x32xf32> to vector<16x32xbf16>
    %cst_144 = arith.constant dense<0.000000e+00> : vector<16x256xf32>
    %388 = tpu.matmul %387, %276, %cst_144 {dimension_numbers = #tpu.dot_dimension_numbers<[1], [0], [0], [1], [0, 0, 1, 1], [], []>} : vector<16x32xbf16>, vector<32x256xbf16>, vector<16x256xf32> -> vector<16x256xf32>
    %c32_145 = arith.constant 32 : index
    %c0_146 = arith.constant 0 : index
    %389 = vector.load %arg9[%c32_145, %c0_146] : memref<64x256xf32, #tpu.memory_space<vmem>>, vector<8x128xf32>
    %390 = vector.extract_strided_slice %388 {offsets = [0, 0], sizes = [8, 128], strides = [1, 1]} : vector<16x256xf32> to vector<8x128xf32>
    %391 = arith.addf %389, %390 : vector<8x128xf32>
    %c24_147 = arith.constant 24 : index
    %c128_148 = arith.constant 128 : index
    %392 = vector.load %arg9[%c24_147, %c128_148] : memref<64x256xf32, #tpu.memory_space<vmem>>, vector<8x128xf32>
    %393 = vector.extract_strided_slice %388 {offsets = [8, 128], sizes = [8, 128], strides = [1, 1]} : vector<16x256xf32> to vector<8x128xf32>
    %394 = arith.addf %392, %393 : vector<8x128xf32>
    %395 = tpu.concatenate %391, %394 in 0 : vector<8x128xf32>, vector<8x128xf32> -> vector<16x128xf32>
    %cst_149 = arith.constant 5.000000e-01 : f32
    %396 = vector.broadcast %cst_149 : f32 to vector<16x128xf32>
    %397 = arith.mulf %396, %395 : vector<16x128xf32>
    %398 = arith.select %5, %395, %397 : vector<16x128xi1>, vector<16x128xf32>
    %399 = math.tanh %398 : vector<16x128xf32>
    %cst_150 = arith.constant 5.000000e-01 : f32
    %400 = vector.broadcast %cst_150 : f32 to vector<16x128xf32>
    %401 = arith.mulf %400, %399 : vector<16x128xf32>
    %cst_151 = arith.constant 5.000000e-01 : f32
    %402 = vector.broadcast %cst_151 : f32 to vector<16x128xf32>
    %403 = arith.addf %401, %402 : vector<16x128xf32>
    %404 = arith.select %5, %399, %403 : vector<16x128xi1>, vector<16x128xf32>
    %405 = vector.extract_strided_slice %404 {offsets = [0, 0], sizes = [16, 32], strides = [1, 1]} : vector<16x128xf32> to vector<16x32xf32>
    %406 = vector.extract_strided_slice %404 {offsets = [0, 32], sizes = [16, 32], strides = [1, 1]} : vector<16x128xf32> to vector<16x32xf32>
    %407 = vector.extract_strided_slice %404 {offsets = [0, 64], sizes = [16, 32], strides = [1, 1]} : vector<16x128xf32> to vector<16x32xf32>
    %408 = vector.extract_strided_slice %404 {offsets = [0, 96], sizes = [16, 32], strides = [1, 1]} : vector<16x128xf32> to vector<16x32xf32>
    %409 = arith.mulf %406, %384 : vector<16x32xf32>
    %410 = arith.mulf %405, %407 : vector<16x32xf32>
    %411 = arith.addf %409, %410 : vector<16x32xf32>
    %412 = math.tanh %411 : vector<16x32xf32>
    %413 = arith.mulf %408, %412 : vector<16x32xf32>
    %414 = arith.truncf %413 : vector<16x32xf32> to vector<16x32xbf16>
    %cst_152 = arith.constant dense<0.000000e+00> : vector<16x256xf32>
    %415 = tpu.matmul %414, %276, %cst_152 {dimension_numbers = #tpu.dot_dimension_numbers<[1], [0], [0], [1], [0, 0, 1, 1], [], []>} : vector<16x32xbf16>, vector<32x256xbf16>, vector<16x256xf32> -> vector<16x256xf32>
    %c40_153 = arith.constant 40 : index
    %c0_154 = arith.constant 0 : index
    %416 = vector.load %arg9[%c40_153, %c0_154] : memref<64x256xf32, #tpu.memory_space<vmem>>, vector<8x128xf32>
    %417 = vector.extract_strided_slice %415 {offsets = [0, 0], sizes = [8, 128], strides = [1, 1]} : vector<16x256xf32> to vector<8x128xf32>
    %418 = arith.addf %416, %417 : vector<8x128xf32>
    %c16_155 = arith.constant 16 : index
    %c128_156 = arith.constant 128 : index
    %419 = vector.load %arg9[%c16_155, %c128_156] : memref<64x256xf32, #tpu.memory_space<vmem>>, vector<8x128xf32>
    %420 = vector.extract_strided_slice %415 {offsets = [8, 128], sizes = [8, 128], strides = [1, 1]} : vector<16x256xf32> to vector<8x128xf32>
    %421 = arith.addf %419, %420 : vector<8x128xf32>
    %422 = tpu.concatenate %418, %421 in 0 : vector<8x128xf32>, vector<8x128xf32> -> vector<16x128xf32>
    %cst_157 = arith.constant 5.000000e-01 : f32
    %423 = vector.broadcast %cst_157 : f32 to vector<16x128xf32>
    %424 = arith.mulf %423, %422 : vector<16x128xf32>
    %425 = arith.select %5, %422, %424 : vector<16x128xi1>, vector<16x128xf32>
    %426 = math.tanh %425 : vector<16x128xf32>
    %cst_158 = arith.constant 5.000000e-01 : f32
    %427 = vector.broadcast %cst_158 : f32 to vector<16x128xf32>
    %428 = arith.mulf %427, %426 : vector<16x128xf32>
    %cst_159 = arith.constant 5.000000e-01 : f32
    %429 = vector.broadcast %cst_159 : f32 to vector<16x128xf32>
    %430 = arith.addf %428, %429 : vector<16x128xf32>
    %431 = arith.select %5, %426, %430 : vector<16x128xi1>, vector<16x128xf32>
    %432 = vector.extract_strided_slice %431 {offsets = [0, 0], sizes = [16, 32], strides = [1, 1]} : vector<16x128xf32> to vector<16x32xf32>
    %433 = vector.extract_strided_slice %431 {offsets = [0, 32], sizes = [16, 32], strides = [1, 1]} : vector<16x128xf32> to vector<16x32xf32>
    %434 = vector.extract_strided_slice %431 {offsets = [0, 64], sizes = [16, 32], strides = [1, 1]} : vector<16x128xf32> to vector<16x32xf32>
    %435 = vector.extract_strided_slice %431 {offsets = [0, 96], sizes = [16, 32], strides = [1, 1]} : vector<16x128xf32> to vector<16x32xf32>
    %436 = arith.mulf %433, %411 : vector<16x32xf32>
    %437 = arith.mulf %432, %434 : vector<16x32xf32>
    %438 = arith.addf %436, %437 : vector<16x32xf32>
    %439 = math.tanh %438 : vector<16x32xf32>
    %440 = arith.mulf %435, %439 : vector<16x32xf32>
    %441 = arith.truncf %440 : vector<16x32xf32> to vector<16x32xbf16>
    %cst_160 = arith.constant dense<0.000000e+00> : vector<16x256xf32>
    %442 = tpu.matmul %441, %276, %cst_160 {dimension_numbers = #tpu.dot_dimension_numbers<[1], [0], [0], [1], [0, 0, 1, 1], [], []>} : vector<16x32xbf16>, vector<32x256xbf16>, vector<16x256xf32> -> vector<16x256xf32>
    %c48_161 = arith.constant 48 : index
    %c0_162 = arith.constant 0 : index
    %443 = vector.load %arg9[%c48_161, %c0_162] : memref<64x256xf32, #tpu.memory_space<vmem>>, vector<8x128xf32>
    %444 = vector.extract_strided_slice %442 {offsets = [0, 0], sizes = [8, 128], strides = [1, 1]} : vector<16x256xf32> to vector<8x128xf32>
    %445 = arith.addf %443, %444 : vector<8x128xf32>
    %c8_163 = arith.constant 8 : index
    %c128_164 = arith.constant 128 : index
    %446 = vector.load %arg9[%c8_163, %c128_164] : memref<64x256xf32, #tpu.memory_space<vmem>>, vector<8x128xf32>
    %447 = vector.extract_strided_slice %442 {offsets = [8, 128], sizes = [8, 128], strides = [1, 1]} : vector<16x256xf32> to vector<8x128xf32>
    %448 = arith.addf %446, %447 : vector<8x128xf32>
    %449 = tpu.concatenate %445, %448 in 0 : vector<8x128xf32>, vector<8x128xf32> -> vector<16x128xf32>
    %cst_165 = arith.constant 5.000000e-01 : f32
    %450 = vector.broadcast %cst_165 : f32 to vector<16x128xf32>
    %451 = arith.mulf %450, %449 : vector<16x128xf32>
    %452 = arith.select %5, %449, %451 : vector<16x128xi1>, vector<16x128xf32>
    %453 = math.tanh %452 : vector<16x128xf32>
    %cst_166 = arith.constant 5.000000e-01 : f32
    %454 = vector.broadcast %cst_166 : f32 to vector<16x128xf32>
    %455 = arith.mulf %454, %453 : vector<16x128xf32>
    %cst_167 = arith.constant 5.000000e-01 : f32
    %456 = vector.broadcast %cst_167 : f32 to vector<16x128xf32>
    %457 = arith.addf %455, %456 : vector<16x128xf32>
    %458 = arith.select %5, %453, %457 : vector<16x128xi1>, vector<16x128xf32>
    %459 = vector.extract_strided_slice %458 {offsets = [0, 0], sizes = [16, 32], strides = [1, 1]} : vector<16x128xf32> to vector<16x32xf32>
    %460 = vector.extract_strided_slice %458 {offsets = [0, 32], sizes = [16, 32], strides = [1, 1]} : vector<16x128xf32> to vector<16x32xf32>
    %461 = vector.extract_strided_slice %458 {offsets = [0, 64], sizes = [16, 32], strides = [1, 1]} : vector<16x128xf32> to vector<16x32xf32>
    %462 = vector.extract_strided_slice %458 {offsets = [0, 96], sizes = [16, 32], strides = [1, 1]} : vector<16x128xf32> to vector<16x32xf32>
    %463 = arith.mulf %460, %438 : vector<16x32xf32>
    %464 = arith.mulf %459, %461 : vector<16x32xf32>
    %465 = arith.addf %463, %464 : vector<16x32xf32>
    %466 = math.tanh %465 : vector<16x32xf32>
    %467 = arith.mulf %462, %466 : vector<16x32xf32>
    %468 = arith.truncf %467 : vector<16x32xf32> to vector<16x32xbf16>
    %cst_168 = arith.constant dense<0.000000e+00> : vector<16x256xf32>
    %469 = tpu.matmul %468, %276, %cst_168 {dimension_numbers = #tpu.dot_dimension_numbers<[1], [0], [0], [1], [0, 0, 1, 1], [], []>} : vector<16x32xbf16>, vector<32x256xbf16>, vector<16x256xf32> -> vector<16x256xf32>
    %c56_169 = arith.constant 56 : index
    %c0_170 = arith.constant 0 : index
    %470 = vector.load %arg9[%c56_169, %c0_170] : memref<64x256xf32, #tpu.memory_space<vmem>>, vector<8x128xf32>
    %471 = vector.extract_strided_slice %469 {offsets = [0, 0], sizes = [8, 128], strides = [1, 1]} : vector<16x256xf32> to vector<8x128xf32>
    %472 = arith.addf %470, %471 : vector<8x128xf32>
    %c0_171 = arith.constant 0 : index
    %c128_172 = arith.constant 128 : index
    %473 = vector.load %arg9[%c0_171, %c128_172] : memref<64x256xf32, #tpu.memory_space<vmem>>, vector<8x128xf32>
    %474 = vector.extract_strided_slice %469 {offsets = [8, 128], sizes = [8, 128], strides = [1, 1]} : vector<16x256xf32> to vector<8x128xf32>
    %475 = arith.addf %473, %474 : vector<8x128xf32>
    %476 = tpu.concatenate %472, %475 in 0 : vector<8x128xf32>, vector<8x128xf32> -> vector<16x128xf32>
    %cst_173 = arith.constant 5.000000e-01 : f32
    %477 = vector.broadcast %cst_173 : f32 to vector<16x128xf32>
    %478 = arith.mulf %477, %476 : vector<16x128xf32>
    %479 = arith.select %5, %476, %478 : vector<16x128xi1>, vector<16x128xf32>
    %480 = math.tanh %479 : vector<16x128xf32>
    %cst_174 = arith.constant 5.000000e-01 : f32
    %481 = vector.broadcast %cst_174 : f32 to vector<16x128xf32>
    %482 = arith.mulf %481, %480 : vector<16x128xf32>
    %cst_175 = arith.constant 5.000000e-01 : f32
    %483 = vector.broadcast %cst_175 : f32 to vector<16x128xf32>
    %484 = arith.addf %482, %483 : vector<16x128xf32>
    %485 = arith.select %5, %480, %484 : vector<16x128xi1>, vector<16x128xf32>
    %486 = vector.extract_strided_slice %485 {offsets = [0, 0], sizes = [16, 32], strides = [1, 1]} : vector<16x128xf32> to vector<16x32xf32>
    %487 = vector.extract_strided_slice %485 {offsets = [0, 32], sizes = [16, 32], strides = [1, 1]} : vector<16x128xf32> to vector<16x32xf32>
    %488 = vector.extract_strided_slice %485 {offsets = [0, 64], sizes = [16, 32], strides = [1, 1]} : vector<16x128xf32> to vector<16x32xf32>
    %489 = vector.extract_strided_slice %485 {offsets = [0, 96], sizes = [16, 32], strides = [1, 1]} : vector<16x128xf32> to vector<16x32xf32>
    %490 = arith.mulf %487, %465 : vector<16x32xf32>
    %491 = arith.mulf %486, %488 : vector<16x32xf32>
    %492 = arith.addf %490, %491 : vector<16x32xf32>
    %493 = math.tanh %492 : vector<16x32xf32>
    %494 = arith.mulf %489, %493 : vector<16x32xf32>
    %495 = vector.extract_strided_slice %494 {offsets = [0, 0], sizes = [8, 32], strides = [1, 1]} : vector<16x32xf32> to vector<8x32xf32>
    %496 = vector.extract_strided_slice %494 {offsets = [8, 0], sizes = [8, 32], strides = [1, 1]} : vector<16x32xf32> to vector<8x32xf32>
    %497 = tpu.concatenate %495, %496 in 1 : vector<8x32xf32>, vector<8x32xf32> -> vector<8x64xf32>
    %c0_176 = arith.constant 0 : index
    %c0_177 = arith.constant 0 : index
    %498 = vector.load %arg6[%c0_176, %c0_177] : memref<64x4xf32, #tpu.memory_space<vmem>>, vector<64x4xf32>
    %cst_178 = arith.constant dense<0.000000e+00> : vector<8x4xf32>
    %499 = tpu.matmul %497, %498, %cst_178 {dimension_numbers = #tpu.dot_dimension_numbers<[1], [0], [0], [1], [0, 0, 1, 1], [], []>} : vector<8x64xf32>, vector<64x4xf32>, vector<8x4xf32> -> vector<8x4xf32>
    %c0_179 = arith.constant 0 : index
    %c0_180 = arith.constant 0 : index
    %500 = vector.load %arg7[%c0_179, %c0_180] : memref<1x4xf32, #tpu.memory_space<vmem>>, vector<1x4xf32>
    %501 = vector.broadcast %500 : vector<1x4xf32> to vector<8x4xf32>
    %502 = arith.addf %499, %501 : vector<8x4xf32>
    %c0_181 = arith.constant 0 : index
    %c0_182 = arith.constant 0 : index
    %503 = vector.load %arg8[%c0_181, %c0_182] : memref<8x4xf32, #tpu.memory_space<vmem>>, vector<8x4xf32>
    tpu.vector_store %arg8[%c0_181, %c0_182], %502 {strides = array<i32>} : memref<8x4xf32, #tpu.memory_space<vmem>>, vector<8x4xf32>,
    return
  }
}

</mosaic_0001>

<bundles_post_ra>
// kernel: lstm_model_forward.1
= control target key start
LH: loop header
LB: loop body
LE: loop exit
PB: predicated region body
PF: predicated region fallthrough
CT: control target
= control target key end

     0   :  { %13 = vsyncpa [#allocation5], 0  ;;  %s2498_s27 = smov [#allocation4]   ;;  %s3239_s0 = inlined_call_operand.vmem [shape: s32[64,1], index: 0, kind: input, shape index: {}]   ;;  %s3240_s1 = inlined_call_operand.vmem [shape: bf16[64,256], index: 1, kind: input, shape index: {}]   ;;  %s3241_s2 = inlined_call_operand.vmem [shape: bf16[32,256], index: 2, kind: input, shape index: {}]   ;;  %s3242_s3 = inlined_call_operand.vmem [shape: bf16[64,256], index: 3, kind: input, shape index: {}]   ;;  %s3243_s4 = inlined_call_operand.vmem [shape: f32[1,256], index: 4, kind: input, shape index: {}]   ;;  %s3244_s5 = inlined_call_operand.vmem [shape: bf16[32,256], index: 5, kind: input, shape index: {}]   ;;  %s3245_s6 = inlined_call_operand.vmem [shape: f32[64,4], index: 6, kind: input, shape index: {}]   ;;  %s3246_s7 = inlined_call_operand.hbm [shape: f32[1,4], index: 7, kind: input, shape index: {}]   ;;  %s3247_s8 = inlined_call_operand.vmem [shape: f32[8,4], index: 8, kind: output, shape index: {}]  }
   0x1   :  { %s34_s28 = sshll.u32 %s2498_s27, 4  ;;  %s2474_s9 = scalar_lea.hbm %s3246_s7, 16  ;;  %s35_s28 = int_to_ptr.vmem [resolvable:$true] %s34_s28 }
   0x2   :  { %p2475_p0 = scmp.ne.s32.totalorder %s3246_s7, %s2474_s9  ;;  %p2478_p1 = scmp.lt.u32.totalorder %s2474_s9, %s3246_s7 }
   0x4   :  { %p2480_p2 = pnand %p2478_p1, %p2475_p0 }
   0x6   :  { %2483 = shalt.err (!%p2480_p2)
}
   0x7   :  { %s2484_s14 = scalar_lea.vmem %s35_s28, 16  ;;  %s2488_s15 = scalar_lea.vmem %s35_s28, 32 }
   0x8   :  { %p2485_p3 = scmp.ne.s32.totalorder %s35_s28, %s2484_s14  ;;  %p2489_p4 = scmp.lt.s32.totalorder %s35_s28, %s35_s28 }
   0x9   :  { %p2490_p5 = scmp.lt.s32.totalorder %s2488_s15, %s2484_s14 }
   0xb   :  { %p2491_p6 = por %p2490_p5, %p2489_p4 }
   0xd   :  { %p2492_p7 = pnand %p2491_p6, %p2485_p3 }
   0xf   :  { %2495 = shalt.err (!%p2492_p7)
}
  0x10   :  { %37 = dma.hbm_to_vmem [thread:$0]  %s3246_s7, 16, %s35_s28, [#allocation5]  }
  0x11   :  { %2496 = dma.done.wait [#allocation5], 16  }
  0x12   :  { %2497 = vsyncadd [#allocation5], 4294967280  ;;  %v2499_v0 = vmov 0   ;;  %v49_v1 = vld [vmem:[%s3239_s0 + $0x10] sm:$0xff]  ;;  %v47_v2 = vld [vmem:[%s3239_s0] sm:$0xff]  ;;  %v42_v21 = vlaneseq  ;;  %v2500_v26 = vmov 0.0  }
  0x13   :  { %2309 = vset.pattern.permute.xlu1 %v2499_v0  ;;  %2308 = vset.pattern.permute.xlu0 %v2499_v0  ;;  %v50_v3 = vld [vmem:[%s3239_s0 + $0x18] sm:$0xff]  ;;  %v48_v4 = vld [vmem:[%s3239_s0 + $0x8] sm:$0xff]  ;;  %v51_v9 = vld [vmem:[%s3239_s0 + $0x20] sm:$0xff]  ;;  %vm147_vm2 = vcmask 523264   ;;  %vm273_vm12 = vcmask 261120   ;;  %vm377_vm13 = vcmask 523520  }
  0x14   :  { %192 = vmatprep.mubr.bf16.mxu0 %v2499_v0  ;;  %309 = vmatprep.mubr.bf16.mxu1 %v2499_v0  ;;  %v2310_v5 = vld [vmem:[%s3240_s1 + $0x4] ss:$8 sps:$4 sm:$0xff]   ;;  %v2312_v6 = vld [vmem:[%s3240_s1] ss:$8 sps:$4 sm:$0xff]   ;;  %v2313_v7 = vld [vmem:[%s3240_s1 + $0x14] ss:$8 sps:$4 sm:$0xff]  }
  0x15   :  { %62 = vperm.xlu1 %2309, %v49_v1   ;;  %56 = vperm.xlu0 %2308, %v47_v2   ;;  %v52_v8 = vld [vmem:[%s3239_s0 + $0x28] sm:$0xff]  ;;  %v2315_v10 = vld [vmem:[%s3240_s1 + $0x10] ss:$8 sps:$4 sm:$0xff]   ;;  %v2621_v17 = vld [vmem:[%s3241_s2 + $0x14] ss:$8 sps:$4 sm:$0xff]   ;;  %v43_v22 = vand.u32 127, %v42_v21 }
  0x16   :  { %160 = vmatprep.subr.bf16.mxu0 %v2310_v5  ;;  %v2599_v11 = vld [vmem:[%s3241_s2 + $0x4] ss:$8 sps:$4 sm:$0xff]   ;;  %v2604_v12 = vld [vmem:[%s3241_s2] ss:$8 sps:$4 sm:$0xff]   ;;  %v54_v13 = vld [vmem:[%s3239_s0 + $0x38] sm:$0xff]  ;;  %vm2504_vm14 = vmmov 0  }
  0x17   :  { %161 = vmatpush1.bf16.msra.mxu0 %v2312_v6  ;;  %v53_v14 = vld [vmem:[%s3239_s0 + $0x30] sm:$0xff]  ;;  %v2316_v15 = vld [vmem:[%s3240_s1 + $0x24] ss:$8 sps:$4 sm:$0xff]   ;;  %v2320_v16 = vld [vmem:[%s3240_s1 + $0x20] ss:$8 sps:$4 sm:$0xff]   ;;  %277 = vmatprep.subr.bf16.mxu1 %v2599_v11  ;;  %vm44_vm9 = vcmp.ge.s32.totalorder %v43_v22, 64 }
  0x18   :  { %162 = vmatprep.subr.bf16.mxu0 %v2313_v7  ;;  %v2322_v18 = vld [vmem:[%s3240_s1 + $0x34] ss:$8 sps:$4 sm:$0xff]   ;;  %v2630_v19 = vld [vmem:[%s3241_s2 + $0x10] ss:$8 sps:$4 sm:$0xff]   ;;  %278 = vmatpush1.bf16.msra.mxu1 %v2604_v12  ;;  %vm45_vm10 = vcmp.lt.s32.totalorder %v43_v22, 96  ;;  %s2502_s2 = smov 32  }
  0x19   :  { %65 = vperm.xlu1 %2309, %v50_v3   ;;  %59 = vperm.xlu0 %2308, %v48_v4   ;;  %v2326_v20 = vld [vmem:[%s3240_s1 + $0x30] ss:$8 sps:$4 sm:$0xff]   ;;  %vm2668_vm11 = vmand %vm44_vm9, %vm45_vm10  ;;  %s2501_s1 = smov 64   ;;  %v2118_v51 = vld [vmem:[%s3245_s6] sm:$0xff]  ;;  %vm2206_vm15 = vcmask 31744  }
  0x1a   :  { %279 = vmatprep.subr.bf16.mxu1 %v2621_v17 }
  0x1b   :  { %163 = vmatpush1.bf16.msra.mxu0 %v2315_v10 }
  0x1c   :  { %164 = vmatprep.subr.bf16.mxu0 %v2316_v15  ;;  %280 = vmatpush1.bf16.msra.mxu1 %v2630_v19 }
  0x1d   :  { %71 = vperm.xlu1 %2309, %v52_v8   ;;  %68 = vperm.xlu0 %2308, %v51_v9  }
  0x1e   :  { %386 = vmatprep.subr.bf16.mxu1 %v2599_v11 }
  0x1f   :  { %165 = vmatpush1.bf16.msra.mxu0 %v2320_v16  ;;  %310 = vmatmul.mubr.bf16.vlgmr.msra.gmra.mrb[0].mxu1 %v2499_v0 }
  0x20   :  { %166 = vmatprep.subr.bf16.mxu0 %v2322_v18  ;;  %387 = vmatpush1.bf16.msra.mxu1 %v2604_v12 }
  0x21   :  { %77 = vperm.xlu1 %2309, %v54_v13   ;;  %74 = vperm.xlu0 %2308, %v53_v14  }
  0x22   :  { %388 = vmatprep.subr.bf16.mxu1 %v2621_v17  ;;  %418 = vmatprep.mubr.bf16.mxu1 %v2499_v0 }
  0x23   :  { %167 = vmatpush1.bf16.msra.mxu0 %v2326_v20 }
  0x24   :  { %1034 = vmatprep.subr.bf16.mxu0 %v2599_v11  ;;  %389 = vmatpush1.bf16.msra.mxu1 %v2630_v19 }
  0x25   :  { %494 = vmatprep.subr.bf16.mxu1 %v2599_v11 }
  0x94   :  { %v57_v23 = vpop.permute.xlu0 %56  ;;  %v63_v24 = vpop.permute.xlu1 %62 }
  0x95   :  { %vm79_vm0 = vcmp.eq.s32.totalorder %v43_v22, %v57_v23  ;;  %vm81_vm3 = vcmp.eq.s32.totalorder %v43_v22, %v63_v24 }
  0x96   :  { %v87_v27 = vsel %vm79_vm0, 1.0, %v2500_v26  ;;  %v89_v31 = vsel %vm81_vm3, 1.0, %v2500_v26 }
  0x98   :  { %v60_v25 = vpop.permute.xlu0 %59  ;;  %v66_v30 = vpop.permute.xlu1 %65 }
  0x99   :  { %vm80_vm1 = vcmp.eq.s32.totalorder %v43_v22, %v60_v25  ;;  %vm82_vm4 = vcmp.eq.s32.totalorder %v43_v22, %v66_v30 }
  0x9a   :  { %v88_v28 = vsel %vm80_vm1, 1.0, %v2500_v26  ;;  %v90_v32 = vsel %vm82_vm4, 1.0, %v2500_v26 }
  0x9b   :  { %v95_v29 = vpack.c.bf16 %v88_v28, %v87_v27  ;;  %v96_v35 = vpack.c.bf16 %v90_v32, %v89_v31 }
  0x9c   :  { %v72_v33 = vpop.permute.xlu1 %71  ;;  %v69_v34 = vpop.permute.xlu0 %68 }
  0x9d   :  { %2221 = vmatmul.mubr.msk.bf16.vlgmr.msra.gmra.mrb[0].mxu0 %vm147_vm2, %v95_v29  ;;  %vm84_vm5 = vcmp.eq.s32.totalorder %v43_v22, %v72_v33  ;;  %vm83_vm6 = vcmp.eq.s32.totalorder %v43_v22, %v69_v34 }
  0x9e   :  { %202 = vmatprep.mubr.bf16.mxu0 %v2499_v0  ;;  %1035 = vmatpush1.bf16.msra.mxu0 %v2604_v12  ;;  %v92_v36 = vsel %vm84_vm5, 1.0, %v2500_v26  ;;  %v91_v37 = vsel %vm83_vm6, 1.0, %v2500_v26 }
  0x9f   :  { %1036 = vmatprep.subr.bf16.mxu0 %v2621_v17  ;;  %v97_v40 = vpack.c.bf16 %v92_v36, %v91_v37 }
  0xa0   :  { %v78_v38 = vpop.permute.xlu1 %77  ;;  %v75_v39 = vpop.permute.xlu0 %74 }
  0xa1   :  { %vm86_vm7 = vcmp.eq.s32.totalorder %v43_v22, %v78_v38  ;;  %vm85_vm8 = vcmp.eq.s32.totalorder %v43_v22, %v75_v39 }
  0xa2   :  { %1037 = vmatpush1.bf16.msra.mxu0 %v2630_v19  ;;  %v94_v41 = vsel %vm86_vm7, 1.0, %v2500_v26  ;;  %v93_v42 = vsel %vm85_vm8, 1.0, %v2500_v26 }
  0xa3   :  { %v98_v43 = vpack.c.bf16 %v94_v41, %v93_v42 }
  0xa5   :  { %2222 = vmatmul.mubr.msk.bf16.gmra.mrb[4].mxu0 %vm147_vm2, %v96_v35 }
  0xa6   :  { %212 = vmatprep.mubr.bf16.mxu0 %v2499_v0 }
  0xad   :  { %2223 = vmatmul.mubr.msk.bf16.gmra.mrb[8].mxu0 %vm147_vm2, %v97_v40 }
  0xae   :  { %222 = vmatprep.mubr.bf16.mxu0 %v2499_v0 }
  0xb5   :  { %2224 = vmatmul.mubr.msk.bf16.gmra.mrb[12].mxu0 %vm147_vm2, %v98_v43 }
  0xb6   :  { %1066 = vmatprep.mubr.bf16.mxu0 %v2499_v0 }
  0xf2   :  { %v311_v44 = vpop.f32.mrb[0].mxu1 }
  0xf3   :  { %v313_v45 = vpop.f32.mrb[1].mxu1 }
  0xf4   :  { %v314_v46 = vpop.f32.mrb[2].mxu1 }
  0xf5   :  { %v315_v47 = vpop.f32.mrb[3].mxu1 }
 0x170   :  { %v194_v48 = vpop.f32.mrb[0].mxu0 }
 0x171   :  { %v319_v49 = vadd.f32 %v311_v44, %v194_v48  ;;  %v2666_v50 = vpop.f32.mrb[1].mxu0 }
 0x172   :  { %v2672_v52 = vpop.f32.mrb[2].mxu0 }
 0x173   :  { %v322_v53 = vmul.f32 0.5, %v319_v49  ;;  %v2674_v54 = vpop.f32.mrb[3].mxu0 }
 0x175   :  { %v324_v55 = vsel %vm2668_vm11, %v319_v49, %v322_v53 }
 0x176   :  { %2346 = vtanh.f32 %v324_v55 }
 0x178   :  { %v2678_v56 = vpop.f32.mrb[4].mxu0 }
 0x179   :  { %v2680_v57 = vpop.f32.mrb[5].mxu0 }
 0x17a   :  { %v2682_v58 = vpop.f32.mrb[6].mxu0 }
 0x17b   :  { %v2684_v59 = vpop.f32.mrb[7].mxu0 }
 0x180   :  { %v2347_v60 = vpop.eup %2346  ;;  %v2686_v61 = vpop.f32.mrb[8].mxu0 }
 0x181   :  { %v2688_v62 = vpop.f32.mrb[9].mxu0  ;;  %v328_v63 = vmul.f32 0.5, %v2347_v60 }
 0x182   :  { %v2690_v1 = vpop.f32.mrb[10].mxu0 }
 0x183   :  { %v2692_v2 = vpop.f32.mrb[11].mxu0  ;;  %v330_v3 = vadd.f32 0.5, %v328_v63 }
 0x185   :  { %v332_v4 = vsel %vm2668_vm11, %v2347_v60, %v330_v3 }
 0x186   :  { %338 = vrot.lane.b32.xlu0 %v332_v4, %s2501_s1  ;;  %v334_v25 = vmul.f32 0.0, %v332_v4 }
 0x188   :  { %v2697_v5 = vpop.f32.mrb[12].mxu0 }
 0x189   :  { %v226_v6 = vpop.f32.mrb[13].mxu0 }
 0x18a   :  { %v2699_v7 = vpop.f32.mrb[14].mxu0 }
 0x18b   :  { %v230_v8 = vpop.f32.mrb[15].mxu0 }
 0x18c   :  { %v321_v9 = vadd.f32 %v315_v47, %v230_v8 }
 0x18e   :  { %v323_v10 = vmul.f32 0.5, %v321_v9 }
 0x190   :  { %v325_v13 = vsel %vm2668_vm11, %v321_v9, %v323_v10 }
 0x191   :  { %2348 = vtanh.f32 %v325_v13 }
 0x19b   :  { %v2349_v14 = vpop.eup %2348 }
 0x19c   :  { %v329_v15 = vmul.f32 0.5, %v2349_v14 }
 0x19e   :  { %v331_v16 = vadd.f32 0.5, %v329_v15 }
 0x1a0   :  { %v333_v18 = vsel %vm2668_vm11, %v2349_v14, %v331_v16 }
 0x1a1   :  { %340 = vrot.lane.b32.xlu1 %v333_v18, %s2501_s1  ;;  %v335_v30 = vmul.f32 0.0, %v333_v18 }
 0x1f8   :  { %v339_v20 = vpop.permute.xlu0 %338 }
 0x1f9   :  { %v344_v22 = vmul.f32 %v339_v20, %v332_v4 }
 0x1fb   :  { %348 = vrot.lane.b32.xlu0 %v344_v22, %s2502_s2 }
 0x213   :  { %v341_v23 = vpop.permute.xlu1 %340 }
 0x214   :  { %v345_v24 = vmul.f32 %v341_v23, %v333_v18 }
 0x216   :  { %350 = vrot.lane.b32.xlu1 %v345_v24, %s2502_s2 }
 0x26d   :  { %v349_v27 = vpop.permute.xlu0 %348 }
 0x26e   :  { %v354_v28 = vadd.f32 %v349_v27, %v334_v25 }
 0x270   :  { %2350 = vtanh.f32 %v354_v28 }
 0x27a   :  { %v2351_v29 = vpop.eup %2350 }
 0x27b   :  { %360 = vrot.lane.b32.xlu0 %v2351_v29, %s2501_s1 }
 0x288   :  { %v351_v31 = vpop.permute.xlu1 %350 }
 0x289   :  { %v355_v32 = vadd.f32 %v351_v31, %v335_v30 }
 0x28b   :  { %2352 = vtanh.f32 %v355_v32 }
 0x295   :  { %v2353_v33 = vpop.eup %2352 }
 0x296   :  { %362 = vrot.lane.b32.xlu1 %v2353_v33, %s2501_s1 }
 0x2ed   :  { %v361_v34 = vpop.permute.xlu0 %360 }
 0x2ee   :  { %v2710_v36 = vmul.f32 %v361_v34, %v332_v4 }
 0x308   :  { %v363_v35 = vpop.permute.xlu1 %362 }
 0x309   :  { %v2712_v37 = vmul.f32 %v363_v35, %v333_v18 }
 0x30b   :  { %v379_v38 = vpack.c.bf16 %v2712_v37, %v2710_v36 }
 0x30d   :  { %381 = vrot.lane.b32.xlu0 %v379_v38, %s2502_s2 }
 0x37f   :  { %v382_v39 = vpop.permute.xlu0 %381 }
 0x380   :  { %2229 = vmatmul.mubr.msk.bf16.vlgmr.msra.gmra.mrb[4].mxu1 %vm273_vm12, %v382_v39 }
 0x381   :  { %495 = vmatpush1.bf16.msra.mxu1 %v2604_v12  ;;  %526 = vmatprep.mubr.bf16.mxu1 %v2499_v0 }
 0x382   :  { %496 = vmatprep.subr.bf16.mxu1 %v2621_v17 }
 0x385   :  { %497 = vmatpush1.bf16.msra.mxu1 %v2630_v19 }
 0x386   :  { %602 = vmatprep.subr.bf16.mxu1 %v2599_v11 }
 0x453   :  { %v420_v40 = vpop.f32.mrb[4].mxu1 }
 0x454   :  { %v428_v41 = vadd.f32 %v420_v40, %v2672_v52  ;;  %v422_v42 = vpop.f32.mrb[5].mxu1 }
 0x455   :  { %v423_v43 = vpop.f32.mrb[6].mxu1 }
 0x456   :  { %v431_v44 = vmul.f32 0.5, %v428_v41  ;;  %v424_v45 = vpop.f32.mrb[7].mxu1 }
 0x457   :  { %v430_v46 = vadd.f32 %v424_v45, %v226_v6 }
 0x458   :  { %v433_v47 = vsel %vm2668_vm11, %v428_v41, %v431_v44 }
 0x459   :  { %2354 = vtanh.f32 %v433_v47  ;;  %v432_v48 = vmul.f32 0.5, %v430_v46 }
 0x45b   :  { %v434_v49 = vsel %vm2668_vm11, %v430_v46, %v432_v48 }
 0x45c   :  { %2356 = vtanh.f32 %v434_v49 }
 0x463   :  { %v2355_v53 = vpop.eup %2354 }
 0x464   :  { %v437_v55 = vmul.f32 0.5, %v2355_v53 }
 0x466   :  { %v2357_v60 = vpop.eup %2356  ;;  %v439_v63 = vadd.f32 0.5, %v437_v55 }
 0x467   :  { %v438_v3 = vmul.f32 0.5, %v2357_v60 }
 0x468   :  { %v441_v52 = vsel %vm2668_vm11, %v2355_v53, %v439_v63 }
 0x469   :  { %447 = vrot.lane.b32.xlu1 %v441_v52, %s2501_s1  ;;  %v440_v4 = vadd.f32 0.5, %v438_v3  ;;  %v443_v14 = vmul.f32 %v441_v52, %v354_v28 }
 0x46b   :  { %v442_v6 = vsel %vm2668_vm11, %v2357_v60, %v440_v4 }
 0x46c   :  { %449 = vrot.lane.b32.xlu0 %v442_v6, %s2501_s1  ;;  %v444_v18 = vmul.f32 %v442_v6, %v355_v32 }
 0x4db   :  { %v448_v8 = vpop.permute.xlu1 %447 }
 0x4dc   :  { %v453_v9 = vmul.f32 %v448_v8, %v441_v52 }
 0x4de   :  { %457 = vrot.lane.b32.xlu1 %v453_v9, %s2502_s2  ;;  %v450_v10 = vpop.permute.xlu0 %449 }
 0x4df   :  { %v454_v13 = vmul.f32 %v450_v10, %v442_v6 }
 0x4e1   :  { %459 = vrot.lane.b32.xlu0 %v454_v13, %s2502_s2 }
 0x550   :  { %v458_v15 = vpop.permute.xlu1 %457 }
 0x551   :  { %v463_v16 = vadd.f32 %v458_v15, %v443_v14 }
 0x553   :  { %2358 = vtanh.f32 %v463_v16  ;;  %v460_v20 = vpop.permute.xlu0 %459 }
 0x554   :  { %v464_v22 = vadd.f32 %v460_v20, %v444_v18 }
 0x556   :  { %2360 = vtanh.f32 %v464_v22 }
 0x55d   :  { %v2359_v23 = vpop.eup %2358 }
 0x55e   :  { %469 = vrot.lane.b32.xlu1 %v2359_v23, %s2501_s1 }
 0x560   :  { %v2361_v24 = vpop.eup %2360 }
 0x561   :  { %471 = vrot.lane.b32.xlu0 %v2361_v24, %s2501_s1 }
 0x5d0   :  { %v470_v25 = vpop.permute.xlu1 %469 }
 0x5d1   :  { %v2738_v29 = vmul.f32 %v470_v25, %v441_v52 }
 0x5d3   :  { %v472_v27 = vpop.permute.xlu0 %471 }
 0x5d4   :  { %v2740_v30 = vmul.f32 %v472_v27, %v442_v6 }
 0x5d6   :  { %v487_v28 = vpack.c.bf16 %v2740_v30, %v2738_v29 }
 0x5d8   :  { %489 = vrot.lane.b32.xlu1 %v487_v28, %s2502_s2 }
 0x64a   :  { %v490_v31 = vpop.permute.xlu1 %489 }
 0x64b   :  { %2230 = vmatmul.mubr.msk.bf16.vlgmr.msra.gmra.mrb[8].mxu1 %vm273_vm12, %v490_v31 }
 0x64c   :  { %603 = vmatpush1.bf16.msra.mxu1 %v2604_v12  ;;  %634 = vmatprep.mubr.bf16.mxu1 %v2499_v0 }
 0x64d   :  { %604 = vmatprep.subr.bf16.mxu1 %v2621_v17 }
 0x650   :  { %605 = vmatpush1.bf16.msra.mxu1 %v2630_v19 }
 0x651   :  { %710 = vmatprep.subr.bf16.mxu1 %v2599_v11 }
 0x71e   :  { %v528_v32 = vpop.f32.mrb[8].mxu1 }
 0x71f   :  { %v536_v33 = vadd.f32 %v528_v32, %v2678_v56  ;;  %v530_v34 = vpop.f32.mrb[9].mxu1 }
 0x720   :  { %v531_v35 = vpop.f32.mrb[10].mxu1 }
 0x721   :  { %v539_v38 = vmul.f32 0.5, %v536_v33  ;;  %v532_v39 = vpop.f32.mrb[11].mxu1 }
 0x722   :  { %v538_v40 = vadd.f32 %v532_v39, %v2692_v2 }
 0x723   :  { %v541_v41 = vsel %vm2668_vm11, %v536_v33, %v539_v38 }
 0x724   :  { %2362 = vtanh.f32 %v541_v41  ;;  %v540_v42 = vmul.f32 0.5, %v538_v40 }
 0x726   :  { %v542_v43 = vsel %vm2668_vm11, %v538_v40, %v540_v42 }
 0x727   :  { %2364 = vtanh.f32 %v542_v43 }
 0x72e   :  { %v2363_v44 = vpop.eup %2362 }
 0x72f   :  { %v545_v45 = vmul.f32 0.5, %v2363_v44 }
 0x731   :  { %v2365_v46 = vpop.eup %2364  ;;  %v547_v47 = vadd.f32 0.5, %v545_v45 }
 0x732   :  { %v546_v56 = vmul.f32 0.5, %v2365_v46 }
 0x733   :  { %v549_v48 = vsel %vm2668_vm11, %v2363_v44, %v547_v47 }
 0x734   :  { %555 = vrot.lane.b32.xlu0 %v549_v48, %s2501_s1  ;;  %v548_v2 = vadd.f32 0.5, %v546_v56  ;;  %v551_v3 = vmul.f32 %v549_v48, %v463_v16 }
 0x736   :  { %v550_v49 = vsel %vm2668_vm11, %v2365_v46, %v548_v2 }
 0x737   :  { %557 = vrot.lane.b32.xlu1 %v550_v49, %s2501_s1  ;;  %v552_v6 = vmul.f32 %v550_v49, %v464_v22 }
 0x7a6   :  { %v556_v53 = vpop.permute.xlu0 %555 }
 0x7a7   :  { %v561_v55 = vmul.f32 %v556_v53, %v549_v48 }
 0x7a9   :  { %565 = vrot.lane.b32.xlu0 %v561_v55, %s2502_s2  ;;  %v558_v60 = vpop.permute.xlu1 %557 }
 0x7aa   :  { %v562_v63 = vmul.f32 %v558_v60, %v550_v49 }
 0x7ac   :  { %567 = vrot.lane.b32.xlu1 %v562_v63, %s2502_s2 }
 0x81b   :  { %v566_v52 = vpop.permute.xlu0 %565 }
 0x81c   :  { %v571_v4 = vadd.f32 %v566_v52, %v551_v3 }
 0x81e   :  { %2366 = vtanh.f32 %v571_v4  ;;  %v568_v8 = vpop.permute.xlu1 %567 }
 0x81f   :  { %v572_v9 = vadd.f32 %v568_v8, %v552_v6 }
 0x821   :  { %2368 = vtanh.f32 %v572_v9 }
 0x828   :  { %v2367_v10 = vpop.eup %2366 }
 0x829   :  { %577 = vrot.lane.b32.xlu0 %v2367_v10, %s2501_s1 }
 0x82b   :  { %v2369_v13 = vpop.eup %2368 }
 0x82c   :  { %579 = vrot.lane.b32.xlu1 %v2369_v13, %s2501_s1 }
 0x89b   :  { %v578_v14 = vpop.permute.xlu0 %577 }
 0x89c   :  { %v2767_v18 = vmul.f32 %v578_v14, %v549_v48 }
 0x89e   :  { %v580_v15 = vpop.permute.xlu1 %579 }
 0x89f   :  { %v2769_v20 = vmul.f32 %v580_v15, %v550_v49 }
 0x8a1   :  { %v595_v16 = vpack.c.bf16 %v2769_v20, %v2767_v18 }
 0x8a3   :  { %597 = vrot.lane.b32.xlu0 %v595_v16, %s2502_s2 }
 0x915   :  { %v598_v22 = vpop.permute.xlu0 %597 }
 0x916   :  { %2231 = vmatmul.mubr.msk.bf16.vlgmr.msra.gmra.mrb[12].mxu1 %vm273_vm12, %v598_v22 }
 0x917   :  { %711 = vmatpush1.bf16.msra.mxu1 %v2604_v12  ;;  %742 = vmatprep.mubr.bf16.mxu1 %v2499_v0 }
 0x918   :  { %712 = vmatprep.subr.bf16.mxu1 %v2621_v17 }
 0x91b   :  { %713 = vmatpush1.bf16.msra.mxu1 %v2630_v19 }
 0x91c   :  { %818 = vmatprep.subr.bf16.mxu1 %v2599_v11 }
 0x9e9   :  { %v636_v23 = vpop.f32.mrb[12].mxu1 }
 0x9ea   :  { %v644_v24 = vadd.f32 %v636_v23, %v2682_v58  ;;  %v638_v25 = vpop.f32.mrb[13].mxu1 }
 0x9eb   :  { %v639_v27 = vpop.f32.mrb[14].mxu1 }
 0x9ec   :  { %v647_v28 = vmul.f32 0.5, %v644_v24  ;;  %v640_v31 = vpop.f32.mrb[15].mxu1 }
 0x9ed   :  { %v646_v32 = vadd.f32 %v640_v31, %v2688_v62 }
 0x9ee   :  { %v649_v33 = vsel %vm2668_vm11, %v644_v24, %v647_v28 }
 0x9ef   :  { %2370 = vtanh.f32 %v649_v33  ;;  %v648_v34 = vmul.f32 0.5, %v646_v32 }
 0x9f1   :  { %v650_v35 = vsel %vm2668_vm11, %v646_v32, %v648_v34 }
 0x9f2   :  { %2372 = vtanh.f32 %v650_v35 }
 0x9f9   :  { %v2371_v38 = vpop.eup %2370 }
 0x9fa   :  { %v653_v39 = vmul.f32 0.5, %v2371_v38 }
 0x9fc   :  { %v2373_v40 = vpop.eup %2372  ;;  %v655_v41 = vadd.f32 0.5, %v653_v39 }
 0x9fd   :  { %v654_v58 = vmul.f32 0.5, %v2373_v40 }
 0x9fe   :  { %v657_v42 = vsel %vm2668_vm11, %v2371_v38, %v655_v41 }
 0x9ff   :  { %663 = vrot.lane.b32.xlu1 %v657_v42, %s2501_s1  ;;  %v656_v62 = vadd.f32 0.5, %v654_v58  ;;  %v659_v56 = vmul.f32 %v657_v42, %v571_v4 }
 0xa01   :  { %v658_v43 = vsel %vm2668_vm11, %v2373_v40, %v656_v62 }
 0xa02   :  { %665 = vrot.lane.b32.xlu0 %v658_v43, %s2501_s1  ;;  %v660_v49 = vmul.f32 %v658_v43, %v572_v9 }
 0xa71   :  { %v664_v44 = vpop.permute.xlu1 %663 }
 0xa72   :  { %v669_v45 = vmul.f32 %v664_v44, %v657_v42 }
 0xa74   :  { %673 = vrot.lane.b32.xlu1 %v669_v45, %s2502_s2  ;;  %v666_v46 = vpop.permute.xlu0 %665 }
 0xa75   :  { %v670_v47 = vmul.f32 %v666_v46, %v658_v43 }
 0xa77   :  { %675 = vrot.lane.b32.xlu0 %v670_v47, %s2502_s2 }
 0xae6   :  { %v674_v48 = vpop.permute.xlu1 %673 }
 0xae7   :  { %v679_v2 = vadd.f32 %v674_v48, %v659_v56 }
 0xae9   :  { %2374 = vtanh.f32 %v679_v2  ;;  %v676_v53 = vpop.permute.xlu0 %675 }
 0xaea   :  { %v680_v55 = vadd.f32 %v676_v53, %v660_v49 }
 0xaec   :  { %2376 = vtanh.f32 %v680_v55 }
 0xaf3   :  { %v2375_v60 = vpop.eup %2374 }
 0xaf4   :  { %685 = vrot.lane.b32.xlu1 %v2375_v60, %s2501_s1 }
 0xaf6   :  { %v2377_v63 = vpop.eup %2376 }
 0xaf7   :  { %687 = vrot.lane.b32.xlu0 %v2377_v63, %s2501_s1 }
 0xb66   :  { %v686_v3 = vpop.permute.xlu1 %685 }
 0xb67   :  { %v2796_v6 = vmul.f32 %v686_v3, %v657_v42 }
 0xb69   :  { %v688_v52 = vpop.permute.xlu0 %687 }
 0xb6a   :  { %v2798_v8 = vmul.f32 %v688_v52, %v658_v43 }
 0xb6c   :  { %v703_v4 = vpack.c.bf16 %v2798_v8, %v2796_v6 }
 0xb6e   :  { %705 = vrot.lane.b32.xlu1 %v703_v4, %s2502_s2 }
 0xbe0   :  { %v706_v9 = vpop.permute.xlu1 %705 }
 0xbe1   :  { %2232 = vmatmul.mubr.msk.bf16.vlgmr.msra.gmra.mrb[16].mxu1 %vm273_vm12, %v706_v9 }
 0xbe2   :  { %819 = vmatpush1.bf16.msra.mxu1 %v2604_v12  ;;  %850 = vmatprep.mubr.bf16.mxu1 %v2499_v0 }
 0xbe3   :  { %820 = vmatprep.subr.bf16.mxu1 %v2621_v17 }
 0xbe6   :  { %821 = vmatpush1.bf16.msra.mxu1 %v2630_v19 }
 0xbe7   :  { %926 = vmatprep.subr.bf16.mxu1 %v2599_v11 }
 0xcb4   :  { %v744_v10 = vpop.f32.mrb[16].mxu1 }
 0xcb5   :  { %v752_v13 = vadd.f32 %v744_v10, %v2686_v61  ;;  %v746_v14 = vpop.f32.mrb[17].mxu1 }
 0xcb6   :  { %v747_v15 = vpop.f32.mrb[18].mxu1 }
 0xcb7   :  { %v755_v16 = vmul.f32 0.5, %v752_v13  ;;  %v748_v22 = vpop.f32.mrb[19].mxu1 }
 0xcb8   :  { %v754_v23 = vadd.f32 %v748_v22, %v2684_v59 }
 0xcb9   :  { %v757_v24 = vsel %vm2668_vm11, %v752_v13, %v755_v16 }
 0xcba   :  { %2378 = vtanh.f32 %v757_v24  ;;  %v756_v25 = vmul.f32 0.5, %v754_v23 }
 0xcbc   :  { %v758_v27 = vsel %vm2668_vm11, %v754_v23, %v756_v25 }
 0xcbd   :  { %2380 = vtanh.f32 %v758_v27 }
 0xcc4   :  { %v2379_v28 = vpop.eup %2378 }
 0xcc5   :  { %v761_v11 = vmul.f32 0.5, %v2379_v28 }
 0xcc7   :  { %v2381_v31 = vpop.eup %2380  ;;  %v763_v32 = vadd.f32 0.5, %v761_v11 }
 0xcc8   :  { %v762_v61 = vmul.f32 0.5, %v2381_v31 }
 0xcc9   :  { %v765_v33 = vsel %vm2668_vm11, %v2379_v28, %v763_v32 }
 0xcca   :  { %771 = vrot.lane.b32.xlu0 %v765_v33, %s2501_s1  ;;  %v764_v59 = vadd.f32 0.5, %v762_v61  ;;  %v767_v41 = vmul.f32 %v765_v33, %v679_v2 }
 0xccc   :  { %v766_v34 = vsel %vm2668_vm11, %v2381_v31, %v764_v59 }
 0xccd   :  { %773 = vrot.lane.b32.xlu1 %v766_v34, %s2501_s1  ;;  %v768_v62 = vmul.f32 %v766_v34, %v680_v55 }
 0xd3c   :  { %v772_v35 = vpop.permute.xlu0 %771 }
 0xd3d   :  { %v777_v38 = vmul.f32 %v772_v35, %v765_v33 }
 0xd3f   :  { %781 = vrot.lane.b32.xlu0 %v777_v38, %s2502_s2  ;;  %v774_v39 = vpop.permute.xlu1 %773 }
 0xd40   :  { %v778_v40 = vmul.f32 %v774_v39, %v766_v34 }
 0xd42   :  { %783 = vrot.lane.b32.xlu1 %v778_v40, %s2502_s2 }
 0xdb1   :  { %v782_v58 = vpop.permute.xlu0 %781 }
 0xdb2   :  { %v787_v42 = vadd.f32 %v782_v58, %v767_v41 }
 0xdb4   :  { %2382 = vtanh.f32 %v787_v42  ;;  %v784_v43 = vpop.permute.xlu1 %783 }
 0xdb5   :  { %v788_v44 = vadd.f32 %v784_v43, %v768_v62 }
 0xdb7   :  { %2384 = vtanh.f32 %v788_v44 }
 0xdbe   :  { %v2383_v45 = vpop.eup %2382 }
 0xdbf   :  { %793 = vrot.lane.b32.xlu0 %v2383_v45, %s2501_s1 }
 0xdc1   :  { %v2385_v46 = vpop.eup %2384 }
 0xdc2   :  { %795 = vrot.lane.b32.xlu1 %v2385_v46, %s2501_s1 }
 0xe31   :  { %v794_v47 = vpop.permute.xlu0 %793 }
 0xe32   :  { %v2825_v48 = vmul.f32 %v794_v47, %v765_v33 }
 0xe34   :  { %v796_v56 = vpop.permute.xlu1 %795 }
 0xe35   :  { %v2827_v49 = vmul.f32 %v796_v56, %v766_v34 }
 0xe37   :  { %v811_v2 = vpack.c.bf16 %v2827_v49, %v2825_v48 }
 0xe39   :  { %813 = vrot.lane.b32.xlu0 %v811_v2, %s2502_s2 }
 0xeab   :  { %v814_v53 = vpop.permute.xlu0 %813 }
 0xeac   :  { %2233 = vmatmul.mubr.msk.bf16.vlgmr.msra.gmra.mrb[20].mxu1 %vm273_vm12, %v814_v53 }
 0xead   :  { %927 = vmatpush1.bf16.msra.mxu1 %v2604_v12  ;;  %958 = vmatprep.mubr.bf16.mxu1 %v2499_v0 }
 0xeae   :  { %928 = vmatprep.subr.bf16.mxu1 %v2621_v17 }
 0xeb1   :  { %929 = vmatpush1.bf16.msra.mxu1 %v2630_v19 }
 0xf7f   :  { %v852_v55 = vpop.f32.mrb[20].mxu1 }
 0xf80   :  { %v860_v60 = vadd.f32 %v852_v55, %v2690_v1  ;;  %v854_v63 = vpop.f32.mrb[21].mxu1 }
 0xf81   :  { %v855_v3 = vpop.f32.mrb[22].mxu1 }
 0xf82   :  { %v863_v52 = vmul.f32 0.5, %v860_v60  ;;  %v856_v4 = vpop.f32.mrb[23].mxu1 }
 0xf83   :  { %v862_v9 = vadd.f32 %v856_v4, %v2680_v57 }
 0xf84   :  { %v865_v10 = vsel %vm2668_vm11, %v860_v60, %v863_v52 }
 0xf85   :  { %2386 = vtanh.f32 %v865_v10  ;;  %v864_v12 = vmul.f32 0.5, %v862_v9 }
 0xf87   :  { %v866_v13 = vsel %vm2668_vm11, %v862_v9, %v864_v12 }
 0xf88   :  { %2388 = vtanh.f32 %v866_v13 }
 0xf8f   :  { %v2387_v17 = vpop.eup %2386 }
 0xf90   :  { %v869_v19 = vmul.f32 0.5, %v2387_v17 }
 0xf92   :  { %v2389_v14 = vpop.eup %2388  ;;  %v871_v15 = vadd.f32 0.5, %v869_v19 }
 0xf93   :  { %v870_v1 = vmul.f32 0.5, %v2389_v14 }
 0xf94   :  { %v873_v16 = vsel %vm2668_vm11, %v2387_v17, %v871_v15 }
 0xf95   :  { %879 = vrot.lane.b32.xlu1 %v873_v16, %s2501_s1  ;;  %v872_v57 = vadd.f32 0.5, %v870_v1  ;;  %v875_v28 = vmul.f32 %v873_v16, %v787_v42 }
 0xf97   :  { %v874_v22 = vsel %vm2668_vm11, %v2389_v14, %v872_v57 }
 0xf98   :  { %881 = vrot.lane.b32.xlu0 %v874_v22, %s2501_s1  ;;  %v876_v32 = vmul.f32 %v874_v22, %v788_v44 }
0x1007   :  { %v880_v23 = vpop.permute.xlu1 %879 }
0x1008   :  { %v885_v24 = vmul.f32 %v880_v23, %v873_v16 }
0x100a   :  { %889 = vrot.lane.b32.xlu1 %v885_v24, %s2502_s2  ;;  %v882_v25 = vpop.permute.xlu0 %881 }
0x100b   :  { %v886_v27 = vmul.f32 %v882_v25, %v874_v22 }
0x100d   :  { %891 = vrot.lane.b32.xlu0 %v886_v27, %s2502_s2 }
0x107c   :  { %v890_v11 = vpop.permute.xlu1 %889 }
0x107d   :  { %v895_v31 = vadd.f32 %v890_v11, %v875_v28 }
0x107f   :  { %2390 = vtanh.f32 %v895_v31  ;;  %v892_v61 = vpop.permute.xlu0 %891 }
0x1080   :  { %v896_v33 = vadd.f32 %v892_v61, %v876_v32 }
0x1082   :  { %2392 = vtanh.f32 %v896_v33 }
0x1089   :  { %v2391_v59 = vpop.eup %2390 }
0x108a   :  { %901 = vrot.lane.b32.xlu1 %v2391_v59, %s2501_s1 }
0x108c   :  { %v2393_v34 = vpop.eup %2392 }
0x108d   :  { %903 = vrot.lane.b32.xlu0 %v2393_v34, %s2501_s1 }
0x10fc   :  { %v902_v35 = vpop.permute.xlu1 %901 }
0x10fd   :  { %v2853_v39 = vmul.f32 %v902_v35, %v873_v16 }
0x10ff   :  { %v904_v38 = vpop.permute.xlu0 %903 }
0x1100   :  { %v2855_v40 = vmul.f32 %v904_v38, %v874_v22 }
0x1102   :  { %v919_v41 = vpack.c.bf16 %v2855_v40, %v2853_v39 }
0x1104   :  { %921 = vrot.lane.b32.xlu1 %v919_v41, %s2502_s2 }
0x1176   :  { %v922_v58 = vpop.permute.xlu1 %921 }
0x1177   :  { %2234 = vmatmul.mubr.msk.bf16.vlgmr.msra.gmra.mrb[24].mxu1 %vm273_vm12, %v922_v58 }
0x1178   :  { %1251 = vmatprep.mubr.bf16.mxu1 %v2499_v0 }
0x124a   :  { %v960_v42 = vpop.f32.mrb[24].mxu1 }
0x124b   :  { %v968_v62 = vadd.f32 %v960_v42, %v2697_v5  ;;  %v962_v43 = vpop.f32.mrb[25].mxu1 }
0x124c   :  { %v963_v44 = vpop.f32.mrb[26].mxu1 }
0x124d   :  { %v971_v45 = vmul.f32 0.5, %v968_v62  ;;  %v964_v46 = vpop.f32.mrb[27].mxu1 }
0x124e   :  { %v970_v47 = vadd.f32 %v964_v46, %v2674_v54 }
0x124f   :  { %v973_v56 = vsel %vm2668_vm11, %v968_v62, %v971_v45 }
0x1250   :  { %2394 = vtanh.f32 %v973_v56  ;;  %v972_v2 = vmul.f32 0.5, %v970_v47 }
0x1252   :  { %v974_v53 = vsel %vm2668_vm11, %v970_v47, %v972_v2 }
0x1253   :  { %2396 = vtanh.f32 %v974_v53 }
0x125a   :  { %v2395_v55 = vpop.eup %2394 }
0x125b   :  { %v977_v60 = vmul.f32 0.5, %v2395_v55 }
0x125d   :  { %v2397_v63 = vpop.eup %2396  ;;  %v979_v3 = vadd.f32 0.5, %v977_v60 }
0x125e   :  { %v978_v5 = vmul.f32 0.5, %v2397_v63 }
0x125f   :  { %v981_v52 = vsel %vm2668_vm11, %v2395_v55, %v979_v3 }
0x1260   :  { %987 = vrot.lane.b32.xlu0 %v981_v52, %s2501_s1  ;;  %v980_v54 = vadd.f32 0.5, %v978_v5  ;;  %v983_v17 = vmul.f32 %v981_v52, %v895_v31 }
0x1262   :  { %v982_v4 = vsel %vm2668_vm11, %v2397_v63, %v980_v54 }
0x1263   :  { %989 = vrot.lane.b32.xlu1 %v982_v4, %s2501_s1  ;;  %v984_v15 = vmul.f32 %v982_v4, %v896_v33 }
0x12d2   :  { %v988_v9 = vpop.permute.xlu0 %987 }
0x12d3   :  { %v993_v10 = vmul.f32 %v988_v9, %v981_v52  ;;  %v2328_v9 = vld [vmem:[%s3242_s3] ss:$8 sps:$4 sm:$0xff]  }
0x12d5   :  { %997 = vrot.lane.b32.xlu0 %v993_v10, %s2502_s2  ;;  %v990_v12 = vpop.permute.xlu1 %989  ;;  %v2330_v10 = vld [vmem:[%s3242_s3 + $0x4] ss:$8 sps:$4 sm:$0xff]  }
0x12d6   :  { %v994_v13 = vmul.f32 %v990_v12, %v982_v4  ;;  %1219 = vmatprep.subr.bf16.mxu1 %v2330_v10  ;;  %v2340_v12 = vld [vmem:[%s3242_s3 + $0x30] ss:$8 sps:$4 sm:$0xff]  }
0x12d7   :  { %1220 = vmatpush1.bf16.msra.mxu1 %v2328_v9 }
0x12d8   :  { %999 = vrot.lane.b32.xlu1 %v994_v13, %s2502_s2  ;;  %v2957_v13 = vld [vmem:[%s3244_s5 + $0x14] ss:$8 sps:$4 sm:$0xff]  }
0x1347   :  { %v998_v19 = vpop.permute.xlu0 %997 }
0x1348   :  { %v1003_v14 = vadd.f32 %v998_v19, %v983_v17  ;;  %v2962_v19 = vld [vmem:[%s3244_s5 + $0x10] ss:$8 sps:$4 sm:$0xff]  }
0x134a   :  { %2398 = vtanh.f32 %v1003_v14  ;;  %v1000_v1 = vpop.permute.xlu1 %999 }
0x134b   :  { %v1004_v16 = vadd.f32 %v1000_v1, %v984_v15 }
0x134d   :  { %2400 = vtanh.f32 %v1004_v16 }
0x1354   :  { %v2399_v57 = vpop.eup %2398 }
0x1355   :  { %1009 = vrot.lane.b32.xlu0 %v2399_v57, %s2501_s1 }
0x1357   :  { %v2401_v22 = vpop.eup %2400 }
0x1358   :  { %1011 = vrot.lane.b32.xlu1 %v2401_v22, %s2501_s1 }
0x13c7   :  { %v1010_v23 = vpop.permute.xlu0 %1009 }
0x13c8   :  { %v1015_v25 = vmul.f32 %v1010_v23, %v981_v52 }
0x13ca   :  { %v1012_v24 = vpop.permute.xlu1 %1011 }
0x13cb   :  { %v1016_v27 = vmul.f32 %v1012_v24, %v982_v4 }
0x13cd   :  { %v1027_v28 = vpack.c.bf16 %v1016_v27, %v1015_v25 }
0x13cf   :  { %1029 = vrot.lane.b32.xlu0 %v1027_v28, %s2502_s2 }
0x1441   :  { %v1030_v11 = vpop.permute.xlu0 %1029 }
0x1442   :  { %2235 = vmatmul.mubr.msk.bf16.vlgmr.msra.gmra.mrb[16].mxu0 %vm273_vm12, %v1030_v11 }
0x1443   :  { %1364 = vmatprep.mubr.bf16.mxu0 %v2499_v0 }
0x1515   :  { %v1068_v31 = vpop.f32.mrb[16].mxu0 }
0x1516   :  { %v1076_v32 = vadd.f32 %v1068_v31, %v2699_v7  ;;  %v1070_v61 = vpop.f32.mrb[17].mxu0 }
0x1517   :  { %v1071_v33 = vpop.f32.mrb[18].mxu0 }
0x1518   :  { %v1079_v59 = vmul.f32 0.5, %v1076_v32  ;;  %v1072_v34 = vpop.f32.mrb[19].mxu0 }
0x1519   :  { %v1078_v35 = vadd.f32 %v1072_v34, %v2666_v50 }
0x151a   :  { %v1081_v38 = vsel %vm2668_vm11, %v1076_v32, %v1079_v59 }
0x151b   :  { %2402 = vtanh.f32 %v1081_v38  ;;  %v1080_v41 = vmul.f32 0.5, %v1078_v35 }
0x151d   :  { %v1082_v58 = vsel %vm2668_vm11, %v1078_v35, %v1080_v41 }
0x151e   :  { %2404 = vtanh.f32 %v1082_v58 }
0x1525   :  { %v2403_v42 = vpop.eup %2402 }
0x1526   :  { %v1085_v62 = vmul.f32 0.5, %v2403_v42 }
0x1528   :  { %v2405_v43 = vpop.eup %2404  ;;  %v1087_v44 = vadd.f32 0.5, %v1085_v62 }
0x1529   :  { %v1086_v7 = vmul.f32 0.5, %v2405_v43 }
0x152a   :  { %v2889_v45 = vsel %vm2668_vm11, %v2403_v42, %v1087_v44 }
0x152b   :  { %1095 = vrot.lane.b32.xlu0 %v2889_v45, %s2501_s1  ;;  %v1088_v50 = vadd.f32 0.5, %v1086_v7  ;;  %v1091_v55 = vmul.f32 %v2889_v45, %v1003_v14 }
0x152d   :  { %v1090_v46 = vsel %vm2668_vm11, %v2405_v43, %v1088_v50 }
0x152e   :  { %1097 = vrot.lane.b32.xlu1 %v1090_v46, %s2501_s1  ;;  %v1092_v3 = vmul.f32 %v1090_v46, %v1004_v16 }
0x159d   :  { %v1096_v47 = vpop.permute.xlu0 %1095 }
0x159e   :  { %v1101_v56 = vmul.f32 %v1096_v47, %v2889_v45  ;;  %v1158_v47 = vshrl.u32 %v42_v21, 7 }
0x15a0   :  { %1105 = vrot.lane.b32.xlu0 %v1101_v56, %s2502_s2  ;;  %v1098_v2 = vpop.permute.xlu1 %1097  ;;  %v1159_v56 = vsub.s32 0, %v1158_v47 }
0x15a1   :  { %v1102_v53 = vmul.f32 %v1098_v2, %v1090_v46  ;;  %v1155_v2 = vld [vmem:[%s3243_s4] sm:$0x3] }
0x15a3   :  { %1107 = vrot.lane.b32.xlu1 %v1102_v53, %s2502_s2  ;;  %v1163_v53 = vsub.s32 1, %v1158_v47 }
0x1612   :  { %v1106_v60 = vpop.permute.xlu0 %1105 }
0x1613   :  { %v1111_v63 = vadd.f32 %v1106_v60, %v1091_v55  ;;  %v1160_v55 = vrot.slane %v1155_v2, %v1159_v56  ;;  %v1164_v60 = vrot.slane %v1155_v2, %v1163_v53 }
0x1615   :  { %2406 = vtanh.f32 %v1111_v63  ;;  %v1108_v5 = vpop.permute.xlu1 %1107 }
0x1616   :  { %v1112_v52 = vadd.f32 %v1108_v5, %v1092_v3 }
0x1618   :  { %2408 = vtanh.f32 %v1112_v52 }
0x161f   :  { %v2407_v54 = vpop.eup %2406 }
0x1620   :  { %1117 = vrot.lane.b32.xlu0 %v2407_v54, %s2501_s1 }
0x1622   :  { %v2409_v4 = vpop.eup %2408 }
0x1623   :  { %1119 = vrot.lane.b32.xlu1 %v2409_v4, %s2501_s1 }
0x1624   :  { %478 = vrot.lane.b32.xlu0 %v2738_v29, %s2502_s2  ;;  %v2331_v29 = vld [vmem:[%s3242_s3 + $0x10] ss:$8 sps:$4 sm:$0xff]  }
0x1627   :  { %369 = vrot.lane.b32.xlu1 %v2710_v36, %s2502_s2  ;;  %v2333_v36 = vld [vmem:[%s3242_s3 + $0x14] ss:$8 sps:$4 sm:$0xff]  }
0x1628   :  { %1221 = vmatprep.subr.bf16.mxu1 %v2333_v36 }
0x1629   :  { %1222 = vmatpush1.bf16.msra.mxu1 %v2331_v29 }
0x162b   :  { %1023 = vrot.lane.b32.xlu1 %v1016_v27, %s2501_s1 }
0x162f   :  { %586 = vrot.lane.b32.xlu1 %v2767_v18, %s2502_s2  ;;  %v2334_v18 = vld [vmem:[%s3242_s3 + $0x20] ss:$8 sps:$4 sm:$0xff]  }
0x1633   :  { %807 = vrot.lane.b32.xlu1 %v2827_v49, %s2501_s1  ;;  %v2939_v49 = vld [vmem:[%s3244_s5 + $0x4] ss:$8 sps:$4 sm:$0xff]  }
0x1634   :  { %1332 = vmatprep.subr.bf16.mxu0 %v2939_v49 }
0x1637   :  { %591 = vrot.lane.b32.xlu1 %v2769_v20, %s2501_s1  ;;  %v2336_v20 = vld [vmem:[%s3242_s3 + $0x24] ss:$8 sps:$4 sm:$0xff]  }
0x1638   :  { %1223 = vmatprep.subr.bf16.mxu1 %v2336_v20 }
0x1639   :  { %1224 = vmatpush1.bf16.msra.mxu1 %v2334_v18 }
0x163b   :  { %802 = vrot.lane.b32.xlu1 %v2825_v48, %s2502_s2  ;;  %v2342_v48 = vld [vmem:[%s3242_s3 + $0x34] ss:$8 sps:$4 sm:$0xff]  }
0x163c   :  { %1225 = vmatprep.subr.bf16.mxu1 %v2342_v48 }
0x163d   :  { %1226 = vmatpush1.bf16.msra.mxu1 %v2340_v12 }
0x163e   :  { %1822 = vmatprep.subr.bf16.mxu1 %v2939_v49 }
0x163f   :  { %374 = vrot.lane.b32.xlu1 %v2712_v37, %s2501_s1  ;;  %v2944_v37 = vld [vmem:[%s3244_s5] ss:$8 sps:$4 sm:$0xff]  }
0x1640   :  { %1333 = vmatpush1.bf16.msra.mxu0 %v2944_v37 }
0x1641   :  { %1334 = vmatprep.subr.bf16.mxu0 %v2957_v13 }
0x1643   :  { %1018 = vrot.lane.b32.xlu1 %v1015_v25, %s2502_s2 }
0x1644   :  { %1335 = vmatpush1.bf16.msra.mxu0 %v2962_v19 }
0x1645   :  { %1430 = vmatprep.subr.bf16.mxu0 %v2939_v49 }
0x1647   :  { %1365 = vmatmul.mubr.bf16.vlgmr.msra.gmra.mrb[20].mxu0 %v2499_v0 }
0x1648   :  { %1431 = vmatpush1.bf16.msra.mxu0 %v2944_v37  ;;  %1462 = vmatprep.mubr.bf16.mxu0 %v2499_v0 }
0x1649   :  { %1432 = vmatprep.subr.bf16.mxu0 %v2957_v13 }
0x164c   :  { %1433 = vmatpush1.bf16.msra.mxu0 %v2962_v19 }
0x164d   :  { %1528 = vmatprep.subr.bf16.mxu0 %v2939_v49 }
0x1692   :  { %v1118_v17 = vpop.permute.xlu0 %1117 }
0x1693   :  { %v1123_v25 = vmul.f32 %v1118_v17, %v2889_v45 }
0x1695   :  { %v1120_v14 = vpop.permute.xlu1 %1119 }
0x1696   :  { %v1124_v15 = vmul.f32 %v1120_v14, %v1090_v46  ;;  %v479_v1 = vpop.permute.xlu0 %478 }
0x1697   :  { %481 = vst.msk [vmem:[#allocation3 + $0x8] sm:$0xff] %vm273_vm12, %v479_v1 }
0x1698   :  { %1131 = vrot.lane.b32.xlu0 %v1124_v15, %s2501_s1 }
0x1699   :  { %v370_v16 = vpop.permute.xlu1 %369 }
0x169a   :  { %372 = vst.msk [vmem:[#allocation3] sm:$0xff] %vm273_vm12, %v370_v16 }
0x169c   :  { %694 = vrot.lane.b32.xlu0 %v2796_v6, %s2502_s2 }
0x169d   :  { %v1024_v57 = vpop.permute.xlu1 %1023 }
0x169e   :  { %1026 = vst.msk [vmem:[#allocation3 + $0x8] sm:$0xff] %vm377_vm13, %v1024_v57 }
0x16a0   :  { %915 = vrot.lane.b32.xlu0 %v2855_v40, %s2501_s1 }
0x16a1   :  { %v587_v22 = vpop.permute.xlu1 %586 }
0x16a2   :  { %589 = vst.msk [vmem:[#allocation3 + $0x10] sm:$0xff] %vm273_vm12, %v587_v22 }
0x16a4   :  { %699 = vrot.lane.b32.xlu0 %v2798_v8, %s2501_s1 }
0x16a5   :  { %v808_v23 = vpop.permute.xlu1 %807  ;;  %v1136_v11 = vld [vmem:[#allocation3 + $0x8] sm:$0xff] }
0x16a8   :  { %910 = vrot.lane.b32.xlu0 %v2853_v39, %s2502_s2 }
0x16a9   :  { %v592_v6 = vpop.permute.xlu1 %591 }
0x16aa   :  { %594 = vst.msk [vmem:[#allocation3 + $0x28] sm:$0xff] %vm377_vm13, %v592_v6 }
0x16ac   :  { %483 = vrot.lane.b32.xlu0 %v2740_v30, %s2501_s1 }
0x16ad   :  { %v803_v24 = vpop.permute.xlu1 %802 }
0x16b0   :  { %1126 = vrot.lane.b32.xlu0 %v1123_v25, %s2502_s2 }
0x16b1   :  { %v375_v40 = vpop.permute.xlu1 %374 }
0x16b2   :  { %378 = vst.msk [vmem:[#allocation3 + $0x38] sm:$0xff] %vm377_vm13, %v375_v40 }
0x16b5   :  { %v1019_v35 = vpop.permute.xlu1 %1018 }
0x170a   :  { %v1132_v27 = vpop.permute.xlu0 %1131 }
0x170b   :  { %1134 = vst.msk [vmem:[#allocation3] sm:$0xff] %vm377_vm13, %v1132_v27 }
0x170e   :  { %v695_v8 = vpop.permute.xlu0 %694 }
0x170f   :  { %697 = vst.msk [vmem:[#allocation3 + $0x18] sm:$0xff] %vm273_vm12, %v695_v8 }
0x1710   :  { %810 = vst.msk [vmem:[#allocation3 + $0x18] sm:$0xff] %vm377_vm13, %v808_v23 }
0x1712   :  { %v916_v39 = vpop.permute.xlu0 %915  ;;  %v1135_v28 = vld [vmem:[#allocation3] sm:$0xff] }
0x1713   :  { %918 = vst.msk [vmem:[#allocation3 + $0x10] sm:$0xff] %vm377_vm13, %v916_v39  ;;  %v1143_v30 = vpack.c.bf16 %v1136_v11, %v1135_v28 }
0x1715   :  { %2244 = vmatmul.mubr.msk.bf16.vlgmr.msra.gmra.mrb[28].mxu1 %vm147_vm2, %v1143_v30 }
0x1716   :  { %v700_v31 = vpop.permute.xlu0 %699  ;;  %1261 = vmatprep.mubr.bf16.mxu1 %v2499_v0  ;;  %1823 = vmatpush1.bf16.msra.mxu1 %v2944_v37 }
0x1717   :  { %702 = vst.msk [vmem:[#allocation3 + $0x20] sm:$0xff] %vm377_vm13, %v700_v31  ;;  %1824 = vmatprep.subr.bf16.mxu1 %v2957_v13  ;;  %v1138_v33 = vld [vmem:[#allocation3 + $0x18] sm:$0xff] }
0x1718   :  { %805 = vst.msk [vmem:[#allocation3 + $0x20] sm:$0xff] %vm273_vm12, %v803_v24 }
0x171a   :  { %v911_v32 = vpop.permute.xlu0 %910  ;;  %v1137_v61 = vld [vmem:[#allocation3 + $0x10] sm:$0xff]  ;;  %1825 = vmatpush1.bf16.msra.mxu1 %v2962_v19  ;;  %v1366_v7 = vpop.f32.mrb[20].mxu0 }
0x171b   :  { %913 = vst.msk [vmem:[#allocation3 + $0x28] sm:$0xff] %vm273_vm12, %v911_v32  ;;  %v1144_v59 = vpack.c.bf16 %v1138_v33, %v1137_v61  ;;  %2018 = vmatprep.subr.bf16.mxu1 %v2939_v49  ;;  %v1368_v45 = vpop.f32.mrb[21].mxu0 }
0x171c   :  { %v1369_v50 = vpop.f32.mrb[22].mxu0 }
0x171d   :  { %2245 = vmatmul.mubr.msk.bf16.gmra.mrb[32].mxu1 %vm147_vm2, %v1144_v59  ;;  %v1370_v46 = vpop.f32.mrb[23].mxu0 }
0x171e   :  { %v484_v34 = vpop.permute.xlu0 %483  ;;  %1271 = vmatprep.mubr.bf16.mxu1 %v2499_v0 }
0x171f   :  { %486 = vst.msk [vmem:[#allocation3 + $0x30] sm:$0xff] %vm377_vm13, %v484_v34  ;;  %v1139_v41 = vld [vmem:[#allocation3 + $0x20] sm:$0xff] }
0x1720   :  { %1021 = vst.msk [vmem:[#allocation3 + $0x30] sm:$0xff] %vm273_vm12, %v1019_v35 }
0x1722   :  { %v1127_v38 = vpop.permute.xlu0 %1126  ;;  %v1140_v58 = vld [vmem:[#allocation3 + $0x28] sm:$0xff] }
0x1723   :  { %1129 = vst.msk [vmem:[#allocation3 + $0x38] sm:$0xff] %vm273_vm12, %v1127_v38  ;;  %v1145_v42 = vpack.c.bf16 %v1140_v58, %v1139_v41 }
0x1725   :  { %2246 = vmatmul.mubr.msk.bf16.gmra.mrb[36].mxu1 %vm147_vm2, %v1145_v42 }
0x1726   :  { %1281 = vmatprep.mubr.bf16.mxu1 %v2499_v0 }
0x1727   :  { %v1141_v62 = vld [vmem:[#allocation3 + $0x30] sm:$0xff] }
0x172a   :  { %v1142_v43 = vld [vmem:[#allocation3 + $0x38] sm:$0xff] }
0x172b   :  { %v1146_v44 = vpack.c.bf16 %v1142_v43, %v1141_v62 }
0x172d   :  { %2247 = vmatmul.mubr.msk.bf16.gmra.mrb[40].mxu1 %vm147_vm2, %v1146_v44 }
0x172e   :  { %1854 = vmatprep.mubr.bf16.mxu1 %v2499_v0 }
0x17e8   :  { %v1253_v63 = vpop.f32.mrb[28].mxu1 }
0x17e9   :  { %v1254_v3 = vadd.f32 %v1253_v63, %v1160_v55  ;;  %v1255_v5 = vpop.f32.mrb[29].mxu1 }
0x17ea   :  { %v3019_v52 = vadd.f32 %v1255_v5, %v1164_v60  ;;  %v1257_v54 = vpop.f32.mrb[30].mxu1 }
0x17eb   :  { %v3021_v4 = vadd.f32 %v1257_v54, %v1160_v55  ;;  %v1374_v9 = vadd.f32 %v1366_v7, %v1254_v3  ;;  %v1259_v10 = vpop.f32.mrb[31].mxu1 }
0x17ec   :  { %v3023_v36 = vadd.f32 %v1259_v10, %v1164_v60 }
0x17ed   :  { %v1377_v21 = vmul.f32 0.5, %v1374_v9 }
0x17ef   :  { %v1379_v29 = vsel %vm2668_vm11, %v1374_v9, %v1377_v21 }
0x17f0   :  { %2410 = vtanh.f32 %v1379_v29  ;;  %v1263_v18 = vpop.f32.mrb[32].mxu1 }
0x17f1   :  { %v3027_v20 = vadd.f32 %v1263_v18, %v1160_v55  ;;  %v1265_v48 = vpop.f32.mrb[33].mxu1 }
0x17f2   :  { %v3029_v12 = vadd.f32 %v1265_v48, %v1164_v60  ;;  %v1267_v17 = vpop.f32.mrb[34].mxu1 }
0x17f3   :  { %v3031_v14 = vadd.f32 %v1267_v17, %v1160_v55  ;;  %v1269_v15 = vpop.f32.mrb[35].mxu1 }
0x17f4   :  { %v3033_v1 = vadd.f32 %v1269_v15, %v1164_v60 }
0x17f8   :  { %v1273_v16 = vpop.f32.mrb[36].mxu1 }
0x17f9   :  { %v3035_v57 = vadd.f32 %v1273_v16, %v1160_v55  ;;  %v1275_v22 = vpop.f32.mrb[37].mxu1 }
0x17fa   :  { %v2411_v23 = vpop.eup %2410  ;;  %v3037_v6 = vadd.f32 %v1275_v22, %v1164_v60  ;;  %v1277_v24 = vpop.f32.mrb[38].mxu1 }
0x17fb   :  { %v3039_v25 = vadd.f32 %v1277_v24, %v1160_v55  ;;  %v1279_v40 = vpop.f32.mrb[39].mxu1  ;;  %v1383_v27 = vmul.f32 0.5, %v2411_v23 }
0x17fc   :  { %v3041_v8 = vadd.f32 %v1279_v40, %v1164_v60 }
0x17fd   :  { %v1385_v39 = vadd.f32 0.5, %v1383_v27 }
0x17ff   :  { %v1387_v28 = vsel %vm2668_vm11, %v2411_v23, %v1385_v39 }
0x1800   :  { %1393 = vrot.lane.b32.xlu1 %v1387_v28, %s2501_s1  ;;  %v1283_v11 = vpop.f32.mrb[40].mxu1 }
0x1801   :  { %v3046_v30 = vadd.f32 %v1283_v11, %v1160_v55  ;;  %v1285_v31 = vpop.f32.mrb[41].mxu1 }
0x1802   :  { %v1286_v32 = vadd.f32 %v1285_v31, %v1164_v60  ;;  %v1287_v61 = vpop.f32.mrb[42].mxu1 }
0x1803   :  { %v3048_v33 = vadd.f32 %v1287_v61, %v1160_v55  ;;  %v1289_v59 = vpop.f32.mrb[43].mxu1 }
0x1804   :  { %v1290_v34 = vadd.f32 %v1289_v59, %v1164_v60 }
0x1806   :  { %v1376_v35 = vadd.f32 %v1370_v46, %v1290_v34  ;;  %v1389_v46 = vmul.f32 0.0, %v1387_v28 }
0x1808   :  { %v1378_v38 = vmul.f32 0.5, %v1376_v35 }
0x180a   :  { %v1380_v41 = vsel %vm2668_vm11, %v1376_v35, %v1378_v38 }
0x180b   :  { %2412 = vtanh.f32 %v1380_v41 }
0x1815   :  { %v2413_v58 = vpop.eup %2412 }
0x1816   :  { %v1384_v42 = vmul.f32 0.5, %v2413_v58 }
0x1818   :  { %v1386_v62 = vadd.f32 0.5, %v1384_v42 }
0x181a   :  { %v1388_v43 = vsel %vm2668_vm11, %v2413_v58, %v1386_v62 }
0x181b   :  { %1395 = vrot.lane.b32.xlu0 %v1388_v43, %s2501_s1  ;;  %v1390_v53 = vmul.f32 0.0, %v1388_v43 }
0x1872   :  { %v1394_v44 = vpop.permute.xlu1 %1393 }
0x1873   :  { %v1399_v7 = vmul.f32 %v1394_v44, %v1387_v28 }
0x1875   :  { %1403 = vrot.lane.b32.xlu1 %v1399_v7, %s2502_s2 }
0x188d   :  { %v1396_v45 = vpop.permute.xlu0 %1395 }
0x188e   :  { %v1400_v50 = vmul.f32 %v1396_v45, %v1388_v43 }
0x1890   :  { %1405 = vrot.lane.b32.xlu0 %v1400_v50, %s2502_s2 }
0x18e7   :  { %v1404_v47 = vpop.permute.xlu1 %1403 }
0x18e8   :  { %v1409_v56 = vadd.f32 %v1404_v47, %v1389_v46 }
0x18ea   :  { %2414 = vtanh.f32 %v1409_v56 }
0x18f4   :  { %v2415_v2 = vpop.eup %2414 }
0x18f5   :  { %1415 = vrot.lane.b32.xlu1 %v2415_v2, %s2501_s1 }
0x1902   :  { %v1406_v55 = vpop.permute.xlu0 %1405 }
0x1903   :  { %v1410_v60 = vadd.f32 %v1406_v55, %v1390_v53 }
0x1905   :  { %2416 = vtanh.f32 %v1410_v60 }
0x190f   :  { %v2417_v63 = vpop.eup %2416 }
0x1910   :  { %1417 = vrot.lane.b32.xlu0 %v2417_v63, %s2501_s1 }
0x1967   :  { %v1416_v3 = vpop.permute.xlu1 %1415 }
0x1968   :  { %v1421_v54 = vmul.f32 %v1416_v3, %v1387_v28 }
0x1982   :  { %v1418_v5 = vpop.permute.xlu0 %1417 }
0x1983   :  { %v1422_v9 = vmul.f32 %v1418_v5, %v1388_v43 }
0x1985   :  { %v1423_v10 = vpack.c.bf16 %v1422_v9, %v1421_v54 }
0x1987   :  { %1425 = vrot.lane.b32.xlu1 %v1423_v10, %s2502_s2 }
0x19f9   :  { %v1426_v21 = vpop.permute.xlu1 %1425 }
0x19fa   :  { %2252 = vmatmul.mubr.msk.bf16.vlgmr.msra.gmra.mrb[24].mxu0 %vm273_vm12, %v1426_v21 }
0x19fb   :  { %1529 = vmatpush1.bf16.msra.mxu0 %v2944_v37  ;;  %1560 = vmatprep.mubr.bf16.mxu0 %v2499_v0 }
0x19fc   :  { %1530 = vmatprep.subr.bf16.mxu0 %v2957_v13 }
0x19ff   :  { %1531 = vmatpush1.bf16.msra.mxu0 %v2962_v19 }
0x1a00   :  { %1626 = vmatprep.subr.bf16.mxu0 %v2939_v49 }
0x1acd   :  { %v1464_v29 = vpop.f32.mrb[24].mxu0 }
0x1ace   :  { %v1472_v18 = vadd.f32 %v1464_v29, %v3021_v4  ;;  %v1466_v48 = vpop.f32.mrb[25].mxu0 }
0x1acf   :  { %v1467_v17 = vpop.f32.mrb[26].mxu0 }
0x1ad0   :  { %v1475_v15 = vmul.f32 0.5, %v1472_v18  ;;  %v1468_v16 = vpop.f32.mrb[27].mxu0 }
0x1ad1   :  { %v1474_v22 = vadd.f32 %v1468_v16, %v1286_v32 }
0x1ad2   :  { %v1477_v23 = vsel %vm2668_vm11, %v1472_v18, %v1475_v15 }
0x1ad3   :  { %2418 = vtanh.f32 %v1477_v23  ;;  %v1476_v24 = vmul.f32 0.5, %v1474_v22 }
0x1ad5   :  { %v1478_v40 = vsel %vm2668_vm11, %v1474_v22, %v1476_v24 }
0x1ad6   :  { %2420 = vtanh.f32 %v1478_v40 }
0x1add   :  { %v2419_v27 = vpop.eup %2418 }
0x1ade   :  { %v1481_v39 = vmul.f32 0.5, %v2419_v27 }
0x1ae0   :  { %v2421_v28 = vpop.eup %2420  ;;  %v1483_v11 = vadd.f32 0.5, %v1481_v39 }
0x1ae1   :  { %v1482_v31 = vmul.f32 0.5, %v2421_v28 }
0x1ae2   :  { %v1485_v4 = vsel %vm2668_vm11, %v2419_v27, %v1483_v11 }
0x1ae3   :  { %1491 = vrot.lane.b32.xlu0 %v1485_v4, %s2501_s1  ;;  %v1484_v32 = vadd.f32 0.5, %v1482_v31  ;;  %v1487_v41 = vmul.f32 %v1485_v4, %v1409_v56 }
0x1ae5   :  { %v1486_v61 = vsel %vm2668_vm11, %v2421_v28, %v1484_v32 }
0x1ae6   :  { %1493 = vrot.lane.b32.xlu1 %v1486_v61, %s2501_s1  ;;  %v1488_v62 = vmul.f32 %v1486_v61, %v1410_v60 }
0x1b55   :  { %v1492_v59 = vpop.permute.xlu0 %1491 }
0x1b56   :  { %v1497_v34 = vmul.f32 %v1492_v59, %v1485_v4 }
0x1b58   :  { %1501 = vrot.lane.b32.xlu0 %v1497_v34, %s2502_s2  ;;  %v1494_v35 = vpop.permute.xlu1 %1493 }
0x1b59   :  { %v1498_v38 = vmul.f32 %v1494_v35, %v1486_v61 }
0x1b5b   :  { %1503 = vrot.lane.b32.xlu1 %v1498_v38, %s2502_s2 }
0x1bca   :  { %v1502_v58 = vpop.permute.xlu0 %1501 }
0x1bcb   :  { %v1507_v42 = vadd.f32 %v1502_v58, %v1487_v41 }
0x1bcd   :  { %2422 = vtanh.f32 %v1507_v42  ;;  %v1504_v43 = vpop.permute.xlu1 %1503 }
0x1bce   :  { %v1508_v44 = vadd.f32 %v1504_v43, %v1488_v62 }
0x1bd0   :  { %2424 = vtanh.f32 %v1508_v44 }
0x1bd7   :  { %v2423_v7 = vpop.eup %2422 }
0x1bd8   :  { %1513 = vrot.lane.b32.xlu0 %v2423_v7, %s2501_s1 }
0x1bda   :  { %v2425_v45 = vpop.eup %2424 }
0x1bdb   :  { %1515 = vrot.lane.b32.xlu1 %v2425_v45, %s2501_s1 }
0x1c4a   :  { %v1514_v50 = vpop.permute.xlu0 %1513 }
0x1c4b   :  { %v1519_v47 = vmul.f32 %v1514_v50, %v1485_v4 }
0x1c4d   :  { %v1516_v46 = vpop.permute.xlu1 %1515 }
0x1c4e   :  { %v1520_v2 = vmul.f32 %v1516_v46, %v1486_v61 }
0x1c50   :  { %v1521_v53 = vpack.c.bf16 %v1520_v2, %v1519_v47 }
0x1c52   :  { %1523 = vrot.lane.b32.xlu0 %v1521_v53, %s2502_s2 }
0x1cc4   :  { %v1524_v56 = vpop.permute.xlu0 %1523 }
0x1cc5   :  { %2253 = vmatmul.mubr.msk.bf16.vlgmr.msra.gmra.mrb[28].mxu0 %vm273_vm12, %v1524_v56 }
0x1cc6   :  { %1627 = vmatpush1.bf16.msra.mxu0 %v2944_v37  ;;  %1658 = vmatprep.mubr.bf16.mxu0 %v2499_v0 }
0x1cc7   :  { %1628 = vmatprep.subr.bf16.mxu0 %v2957_v13 }
0x1cca   :  { %1629 = vmatpush1.bf16.msra.mxu0 %v2962_v19 }
0x1ccb   :  { %1724 = vmatprep.subr.bf16.mxu0 %v2939_v49 }
0x1d98   :  { %v1562_v55 = vpop.f32.mrb[28].mxu0 }
0x1d99   :  { %v1570_v60 = vadd.f32 %v1562_v55, %v3027_v20  ;;  %v1564_v63 = vpop.f32.mrb[29].mxu0 }
0x1d9a   :  { %v1565_v3 = vpop.f32.mrb[30].mxu0 }
0x1d9b   :  { %v1573_v5 = vmul.f32 0.5, %v1570_v60  ;;  %v1566_v54 = vpop.f32.mrb[31].mxu0 }
0x1d9c   :  { %v1572_v9 = vadd.f32 %v1566_v54, %v3041_v8 }
0x1d9d   :  { %v1575_v10 = vsel %vm2668_vm11, %v1570_v60, %v1573_v5 }
0x1d9e   :  { %2426 = vtanh.f32 %v1575_v10  ;;  %v1574_v21 = vmul.f32 0.5, %v1572_v9 }
0x1da0   :  { %v1576_v29 = vsel %vm2668_vm11, %v1572_v9, %v1574_v21 }
0x1da1   :  { %2428 = vtanh.f32 %v1576_v29 }
0x1da8   :  { %v2427_v18 = vpop.eup %2426 }
0x1da9   :  { %v1579_v48 = vmul.f32 0.5, %v2427_v18 }
0x1dab   :  { %v2429_v17 = vpop.eup %2428  ;;  %v1581_v15 = vadd.f32 0.5, %v1579_v48 }
0x1dac   :  { %v1580_v20 = vmul.f32 0.5, %v2429_v17 }
0x1dad   :  { %v1583_v16 = vsel %vm2668_vm11, %v2427_v18, %v1581_v15 }
0x1dae   :  { %1589 = vrot.lane.b32.xlu1 %v1583_v16, %s2501_s1  ;;  %v1582_v8 = vadd.f32 0.5, %v1580_v20  ;;  %v1585_v39 = vmul.f32 %v1583_v16, %v1507_v42 }
0x1db0   :  { %v1584_v22 = vsel %vm2668_vm11, %v2429_v17, %v1582_v8 }
0x1db1   :  { %1591 = vrot.lane.b32.xlu0 %v1584_v22, %s2501_s1  ;;  %v1586_v31 = vmul.f32 %v1584_v22, %v1508_v44 }
0x1e20   :  { %v1590_v23 = vpop.permute.xlu1 %1589 }
0x1e21   :  { %v1595_v24 = vmul.f32 %v1590_v23, %v1583_v16 }
0x1e23   :  { %1599 = vrot.lane.b32.xlu1 %v1595_v24, %s2502_s2  ;;  %v1592_v40 = vpop.permute.xlu0 %1591 }
0x1e24   :  { %v1596_v27 = vmul.f32 %v1592_v40, %v1584_v22 }
0x1e26   :  { %1601 = vrot.lane.b32.xlu0 %v1596_v27, %s2502_s2 }
0x1e95   :  { %v1600_v28 = vpop.permute.xlu1 %1599 }
0x1e96   :  { %v1605_v11 = vadd.f32 %v1600_v28, %v1585_v39 }
0x1e98   :  { %2430 = vtanh.f32 %v1605_v11  ;;  %v1602_v4 = vpop.permute.xlu0 %1601 }
0x1e99   :  { %v1606_v32 = vadd.f32 %v1602_v4, %v1586_v31 }
0x1e9b   :  { %2432 = vtanh.f32 %v1606_v32 }
0x1ea2   :  { %v2431_v61 = vpop.eup %2430 }
0x1ea3   :  { %1611 = vrot.lane.b32.xlu1 %v2431_v61, %s2501_s1 }
0x1ea5   :  { %v2433_v59 = vpop.eup %2432 }
0x1ea6   :  { %1613 = vrot.lane.b32.xlu0 %v2433_v59, %s2501_s1 }
0x1f15   :  { %v1612_v34 = vpop.permute.xlu1 %1611 }
0x1f16   :  { %v1617_v38 = vmul.f32 %v1612_v34, %v1583_v16 }
0x1f18   :  { %v1614_v35 = vpop.permute.xlu0 %1613 }
0x1f19   :  { %v1618_v41 = vmul.f32 %v1614_v35, %v1584_v22 }
0x1f1b   :  { %v1619_v58 = vpack.c.bf16 %v1618_v41, %v1617_v38 }
0x1f1d   :  { %1621 = vrot.lane.b32.xlu1 %v1619_v58, %s2502_s2 }
0x1f8f   :  { %v1622_v42 = vpop.permute.xlu1 %1621 }
0x1f90   :  { %2254 = vmatmul.mubr.msk.bf16.vlgmr.msra.gmra.mrb[32].mxu0 %vm273_vm12, %v1622_v42 }
0x1f91   :  { %1725 = vmatpush1.bf16.msra.mxu0 %v2944_v37  ;;  %1756 = vmatprep.mubr.bf16.mxu0 %v2499_v0 }
0x1f92   :  { %1726 = vmatprep.subr.bf16.mxu0 %v2957_v13 }
0x1f95   :  { %1727 = vmatpush1.bf16.msra.mxu0 %v2962_v19 }
0x1f96   :  { %1920 = vmatprep.subr.bf16.mxu0 %v2939_v49 }
0x2063   :  { %v1660_v62 = vpop.f32.mrb[32].mxu0 }
0x2064   :  { %v1668_v43 = vadd.f32 %v1660_v62, %v3031_v14  ;;  %v1662_v44 = vpop.f32.mrb[33].mxu0 }
0x2065   :  { %v1663_v7 = vpop.f32.mrb[34].mxu0 }
0x2066   :  { %v1671_v45 = vmul.f32 0.5, %v1668_v43  ;;  %v1664_v50 = vpop.f32.mrb[35].mxu0 }
0x2067   :  { %v1670_v46 = vadd.f32 %v1664_v50, %v3037_v6 }
0x2068   :  { %v1673_v47 = vsel %vm2668_vm11, %v1668_v43, %v1671_v45 }
0x2069   :  { %2434 = vtanh.f32 %v1673_v47  ;;  %v1672_v2 = vmul.f32 0.5, %v1670_v46 }
0x206b   :  { %v1674_v53 = vsel %vm2668_vm11, %v1670_v46, %v1672_v2 }
0x206c   :  { %2436 = vtanh.f32 %v1674_v53 }
0x2073   :  { %v2435_v56 = vpop.eup %2434 }
0x2074   :  { %v1677_v49 = vmul.f32 0.5, %v2435_v56 }
0x2076   :  { %v2437_v55 = vpop.eup %2436  ;;  %v1679_v60 = vadd.f32 0.5, %v1677_v49 }
0x2077   :  { %v1678_v14 = vmul.f32 0.5, %v2437_v55 }
0x2078   :  { %v1681_v63 = vsel %vm2668_vm11, %v2435_v56, %v1679_v60 }
0x2079   :  { %1687 = vrot.lane.b32.xlu0 %v1681_v63, %s2501_s1  ;;  %v1680_v6 = vadd.f32 0.5, %v1678_v14  ;;  %v1683_v21 = vmul.f32 %v1681_v63, %v1605_v11 }
0x207b   :  { %v1682_v3 = vsel %vm2668_vm11, %v2437_v55, %v1680_v6 }
0x207c   :  { %1689 = vrot.lane.b32.xlu1 %v1682_v3, %s2501_s1  ;;  %v1684_v48 = vmul.f32 %v1682_v3, %v1606_v32 }
0x20eb   :  { %v1688_v5 = vpop.permute.xlu0 %1687 }
0x20ec   :  { %v1693_v54 = vmul.f32 %v1688_v5, %v1681_v63 }
0x20ee   :  { %1697 = vrot.lane.b32.xlu0 %v1693_v54, %s2502_s2  ;;  %v1690_v9 = vpop.permute.xlu1 %1689 }
0x20ef   :  { %v1694_v10 = vmul.f32 %v1690_v9, %v1682_v3 }
0x20f1   :  { %1699 = vrot.lane.b32.xlu1 %v1694_v10, %s2502_s2 }
0x2160   :  { %v1698_v29 = vpop.permute.xlu0 %1697 }
0x2161   :  { %v1703_v18 = vadd.f32 %v1698_v29, %v1683_v21 }
0x2163   :  { %2438 = vtanh.f32 %v1703_v18  ;;  %v1700_v17 = vpop.permute.xlu1 %1699 }
0x2164   :  { %v1704_v15 = vadd.f32 %v1700_v17, %v1684_v48 }
0x2166   :  { %2440 = vtanh.f32 %v1704_v15 }
0x216d   :  { %v2439_v20 = vpop.eup %2438 }
0x216e   :  { %1709 = vrot.lane.b32.xlu0 %v2439_v20, %s2501_s1 }
0x2170   :  { %v2441_v16 = vpop.eup %2440 }
0x2171   :  { %1711 = vrot.lane.b32.xlu1 %v2441_v16, %s2501_s1 }
0x21e0   :  { %v1710_v8 = vpop.permute.xlu0 %1709 }
0x21e1   :  { %v1715_v23 = vmul.f32 %v1710_v8, %v1681_v63 }
0x21e3   :  { %v1712_v22 = vpop.permute.xlu1 %1711 }
0x21e4   :  { %v1716_v24 = vmul.f32 %v1712_v22, %v1682_v3 }
0x21e6   :  { %v1717_v40 = vpack.c.bf16 %v1716_v24, %v1715_v23 }
0x21e8   :  { %1719 = vrot.lane.b32.xlu0 %v1717_v40, %s2502_s2 }
0x225a   :  { %v1720_v27 = vpop.permute.xlu0 %1719 }
0x225b   :  { %2255 = vmatmul.mubr.msk.bf16.vlgmr.msra.gmra.mrb[36].mxu0 %vm273_vm12, %v1720_v27 }
0x225c   :  { %1921 = vmatpush1.bf16.msra.mxu0 %v2944_v37  ;;  %1952 = vmatprep.mubr.bf16.mxu0 %v2499_v0 }
0x225d   :  { %1922 = vmatprep.subr.bf16.mxu0 %v2957_v13 }
0x2260   :  { %1923 = vmatpush1.bf16.msra.mxu0 %v2962_v19 }
0x232e   :  { %v1758_v39 = vpop.f32.mrb[36].mxu0 }
0x232f   :  { %v1766_v28 = vadd.f32 %v1758_v39, %v3035_v57  ;;  %v1760_v11 = vpop.f32.mrb[37].mxu0 }
0x2330   :  { %v1761_v31 = vpop.f32.mrb[38].mxu0 }
0x2331   :  { %v1769_v4 = vmul.f32 0.5, %v1766_v28  ;;  %v1762_v32 = vpop.f32.mrb[39].mxu0 }
0x2332   :  { %v1768_v61 = vadd.f32 %v1762_v32, %v3033_v1 }
0x2333   :  { %v1771_v59 = vsel %vm2668_vm11, %v1766_v28, %v1769_v4 }
0x2334   :  { %2442 = vtanh.f32 %v1771_v59  ;;  %v1770_v34 = vmul.f32 0.5, %v1768_v61 }
0x2336   :  { %v1772_v35 = vsel %vm2668_vm11, %v1768_v61, %v1770_v34 }
0x2337   :  { %2444 = vtanh.f32 %v1772_v35 }
0x233e   :  { %v2443_v38 = vpop.eup %2442 }
0x233f   :  { %v1775_v41 = vmul.f32 0.5, %v2443_v38 }
0x2341   :  { %v2445_v58 = vpop.eup %2444  ;;  %v1777_v42 = vadd.f32 0.5, %v1775_v41 }
0x2342   :  { %v1776_v57 = vmul.f32 0.5, %v2445_v58 }
0x2343   :  { %v1779_v62 = vsel %vm2668_vm11, %v2443_v38, %v1777_v42 }
0x2344   :  { %1785 = vrot.lane.b32.xlu1 %v1779_v62, %s2501_s1  ;;  %v1778_v1 = vadd.f32 0.5, %v1776_v57  ;;  %v1781_v46 = vmul.f32 %v1779_v62, %v1703_v18 }
0x2346   :  { %v1780_v43 = vsel %vm2668_vm11, %v2445_v58, %v1778_v1 }
0x2347   :  { %1787 = vrot.lane.b32.xlu0 %v1780_v43, %s2501_s1  ;;  %v1782_v53 = vmul.f32 %v1780_v43, %v1704_v15 }
0x23b6   :  { %v1786_v44 = vpop.permute.xlu1 %1785 }
0x23b7   :  { %v1791_v7 = vmul.f32 %v1786_v44, %v1779_v62 }
0x23b9   :  { %1795 = vrot.lane.b32.xlu1 %v1791_v7, %s2502_s2  ;;  %v1788_v45 = vpop.permute.xlu0 %1787 }
0x23ba   :  { %v1792_v50 = vmul.f32 %v1788_v45, %v1780_v43 }
0x23bc   :  { %1797 = vrot.lane.b32.xlu0 %v1792_v50, %s2502_s2 }
0x242b   :  { %v1796_v47 = vpop.permute.xlu1 %1795 }
0x242c   :  { %v1801_v2 = vadd.f32 %v1796_v47, %v1781_v46 }
0x242e   :  { %2446 = vtanh.f32 %v1801_v2  ;;  %v1798_v56 = vpop.permute.xlu0 %1797 }
0x242f   :  { %v1802_v49 = vadd.f32 %v1798_v56, %v1782_v53 }
0x2431   :  { %2448 = vtanh.f32 %v1802_v49 }
0x2438   :  { %v2447_v55 = vpop.eup %2446 }
0x2439   :  { %1807 = vrot.lane.b32.xlu1 %v2447_v55, %s2501_s1 }
0x243b   :  { %v2449_v60 = vpop.eup %2448 }
0x243c   :  { %1809 = vrot.lane.b32.xlu0 %v2449_v60, %s2501_s1 }
0x24ab   :  { %v1808_v14 = vpop.permute.xlu1 %1807 }
0x24ac   :  { %v1813_v6 = vmul.f32 %v1808_v14, %v1779_v62 }
0x24ae   :  { %v1810_v63 = vpop.permute.xlu0 %1809 }
0x24af   :  { %v1814_v3 = vmul.f32 %v1810_v63, %v1780_v43 }
0x24b1   :  { %v1815_v5 = vpack.c.bf16 %v1814_v3, %v1813_v6 }
0x24b3   :  { %1817 = vrot.lane.b32.xlu1 %v1815_v5, %s2502_s2 }
0x2525   :  { %v1818_v54 = vpop.permute.xlu1 %1817 }
0x2526   :  { %2256 = vmatmul.mubr.msk.bf16.vlgmr.msra.gmra.mrb[44].mxu1 %vm273_vm12, %v1818_v54 }
0x2527   :  { %2019 = vmatpush1.bf16.msra.mxu1 %v2944_v37  ;;  %2050 = vmatprep.mubr.bf16.mxu1 %v2499_v0 }
0x2528   :  { %2020 = vmatprep.subr.bf16.mxu1 %v2957_v13 }
0x252b   :  { %2021 = vmatpush1.bf16.msra.mxu1 %v2962_v19 }
0x25f9   :  { %v1856_v9 = vpop.f32.mrb[44].mxu1 }
0x25fa   :  { %v1864_v10 = vadd.f32 %v1856_v9, %v3039_v25  ;;  %v1858_v21 = vpop.f32.mrb[45].mxu1 }
0x25fb   :  { %v1859_v29 = vpop.f32.mrb[46].mxu1 }
0x25fc   :  { %v1867_v18 = vmul.f32 0.5, %v1864_v10  ;;  %v1860_v48 = vpop.f32.mrb[47].mxu1 }
0x25fd   :  { %v1866_v17 = vadd.f32 %v1860_v48, %v3029_v12 }
0x25fe   :  { %v1869_v15 = vsel %vm2668_vm11, %v1864_v10, %v1867_v18 }
0x25ff   :  { %2450 = vtanh.f32 %v1869_v15  ;;  %v1868_v37 = vmul.f32 0.5, %v1866_v17 }
0x2601   :  { %v1870_v0 = vsel %vm2668_vm11, %v1866_v17, %v1868_v37 }
0x2602   :  { %2452 = vtanh.f32 %v1870_v0 }
0x2609   :  { %v2451_v13 = vpop.eup %2450 }
0x260a   :  { %v1873_v19 = vmul.f32 0.5, %v2451_v13 }
0x260c   :  { %v2453_v20 = vpop.eup %2452  ;;  %v1875_v16 = vadd.f32 0.5, %v1873_v19 }
0x260d   :  { %v1874_v25 = vmul.f32 0.5, %v2453_v20 }
0x260e   :  { %v1877_v8 = vsel %vm2668_vm11, %v2451_v13, %v1875_v16 }
0x260f   :  { %1883 = vrot.lane.b32.xlu0 %v1877_v8, %s2501_s1  ;;  %v1876_v12 = vadd.f32 0.5, %v1874_v25  ;;  %v1879_v39 = vmul.f32 %v1877_v8, %v1801_v2 }
0x2611   :  { %v1878_v22 = vsel %vm2668_vm11, %v2453_v20, %v1876_v12 }
0x2612   :  { %1885 = vrot.lane.b32.xlu1 %v1878_v22, %s2501_s1  ;;  %v1880_v31 = vmul.f32 %v1878_v22, %v1802_v49 }
0x2681   :  { %v1884_v23 = vpop.permute.xlu0 %1883 }
0x2682   :  { %v1889_v24 = vmul.f32 %v1884_v23, %v1877_v8 }
0x2684   :  { %1893 = vrot.lane.b32.xlu0 %v1889_v24, %s2502_s2  ;;  %v1886_v40 = vpop.permute.xlu1 %1885 }
0x2685   :  { %v1890_v27 = vmul.f32 %v1886_v40, %v1878_v22 }
0x2687   :  { %1895 = vrot.lane.b32.xlu1 %v1890_v27, %s2502_s2 }
0x26f6   :  { %v1894_v28 = vpop.permute.xlu0 %1893 }
0x26f7   :  { %v1899_v11 = vadd.f32 %v1894_v28, %v1879_v39 }
0x26f9   :  { %2454 = vtanh.f32 %v1899_v11  ;;  %v1896_v4 = vpop.permute.xlu1 %1895 }
0x26fa   :  { %v1900_v32 = vadd.f32 %v1896_v4, %v1880_v31 }
0x26fc   :  { %2456 = vtanh.f32 %v1900_v32 }
0x2703   :  { %v2455_v61 = vpop.eup %2454 }
0x2704   :  { %1905 = vrot.lane.b32.xlu0 %v2455_v61, %s2501_s1 }
0x2706   :  { %v2457_v59 = vpop.eup %2456 }
0x2707   :  { %1907 = vrot.lane.b32.xlu1 %v2457_v59, %s2501_s1 }
0x2776   :  { %v1906_v34 = vpop.permute.xlu0 %1905 }
0x2777   :  { %v1911_v38 = vmul.f32 %v1906_v34, %v1877_v8 }
0x2779   :  { %v1908_v35 = vpop.permute.xlu1 %1907 }
0x277a   :  { %v1912_v41 = vmul.f32 %v1908_v35, %v1878_v22 }
0x277c   :  { %v1913_v58 = vpack.c.bf16 %v1912_v41, %v1911_v38 }
0x277e   :  { %1915 = vrot.lane.b32.xlu0 %v1913_v58, %s2502_s2 }
0x27f0   :  { %v1916_v42 = vpop.permute.xlu0 %1915 }
0x27f1   :  { %2257 = vmatmul.mubr.msk.bf16.vlgmr.msra.gmra.mrb[40].mxu0 %vm273_vm12, %v1916_v42 }
0x27f2   :  { %2286 = vmatprep.mubr.msk.f32.mxu0 %vm2504_vm14, %v2500_v26 }
0x28c4   :  { %v1954_v57 = vpop.f32.mrb[40].mxu0 }
0x28c5   :  { %v1962_v62 = vadd.f32 %v1954_v57, %v3046_v30  ;;  %v1956_v1 = vpop.f32.mrb[41].mxu0 }
0x28c6   :  { %v1957_v43 = vpop.f32.mrb[42].mxu0  ;;  %v2119_v1 = vld [vmem:[%s3245_s6 + $0x8] sm:$0xff] }
0x28c7   :  { %v1965_v44 = vmul.f32 0.5, %v1962_v62  ;;  %v1958_v7 = vpop.f32.mrb[43].mxu0  ;;  %v2120_v43 = vld [vmem:[%s3245_s6 + $0x10] sm:$0xff] }
0x28c8   :  { %v1964_v45 = vadd.f32 %v1958_v7, %v3023_v36  ;;  %v2290_v7 = vpack.c.bf16 %v2119_v1, %v2118_v51 }
0x28c9   :  { %v1967_v50 = vsel %vm2668_vm11, %v1962_v62, %v1965_v44  ;;  %v2503_v44 = vmov 0.0|0.0  }
0x28ca   :  { %2458 = vtanh.f32 %v1967_v50  ;;  %v1966_v46 = vmul.f32 0.5, %v1964_v45  ;;  %2289 = vmatprep.subr.bf16.mxu0 %v2503_v44 }
0x28cb   :  { %2291 = vmatpush3.bf16.msra.mxu0 %v2290_v7 }
0x28cc   :  { %v1968_v47 = vsel %vm2668_vm11, %v1964_v45, %v1966_v46  ;;  %v2121_v45 = vld [vmem:[%s3245_s6 + $0x18] sm:$0xff]  ;;  %2292 = vmatprep.subr.bf16.mxu0 %v2503_v44  ;;  %v2122_v46 = vld [vmem:[%s3245_s6 + $0x20] sm:$0xff] }
0x28cd   :  { %2460 = vtanh.f32 %v1968_v47  ;;  %v2293_v50 = vpack.c.bf16 %v2121_v45, %v2120_v43  ;;  %v2123_v47 = vld [vmem:[%s3245_s6 + $0x28] sm:$0xff] }
0x28cf   :  { %2294 = vmatpush3.bf16.msra.mxu0 %v2293_v50 }
0x28d0   :  { %2295 = vmatprep.subr.bf16.mxu0 %v2503_v44 }
0x28d4   :  { %v2459_v2 = vpop.eup %2458 }
0x28d5   :  { %v1971_v53 = vmul.f32 0.5, %v2459_v2 }
0x28d7   :  { %v2461_v56 = vpop.eup %2460  ;;  %v1973_v49 = vadd.f32 0.5, %v1971_v53  ;;  %v2296_v53 = vpack.c.bf16 %v2123_v47, %v2122_v46 }
0x28d8   :  { %v1972_v30 = vmul.f32 0.5, %v2461_v56 }
0x28d9   :  { %v1975_v55 = vsel %vm2668_vm11, %v2459_v2, %v1973_v49  ;;  %2297 = vmatpush3.bf16.msra.mxu0 %v2296_v53  ;;  %v2124_v49 = vld [vmem:[%s3245_s6 + $0x30] sm:$0xff] }
0x28da   :  { %1981 = vrot.lane.b32.xlu1 %v1975_v55, %s2501_s1  ;;  %v1974_v36 = vadd.f32 0.5, %v1972_v30  ;;  %v1977_v5 = vmul.f32 %v1975_v55, %v1899_v11  ;;  %2298 = vmatprep.subr.bf16.mxu0 %v2503_v44  ;;  %v2125_v30 = vld [vmem:[%s3245_s6 + $0x38] sm:$0xff] }
0x28dc   :  { %v1976_v60 = vsel %vm2668_vm11, %v2461_v56, %v1974_v36 }
0x28dd   :  { %1983 = vrot.lane.b32.xlu0 %v1976_v60, %s2501_s1  ;;  %v1978_v10 = vmul.f32 %v1976_v60, %v1900_v32 }
0x294c   :  { %v1982_v14 = vpop.permute.xlu1 %1981 }
0x294d   :  { %v1987_v63 = vmul.f32 %v1982_v14, %v1975_v55 }
0x294f   :  { %1991 = vrot.lane.b32.xlu1 %v1987_v63, %s2502_s2  ;;  %v1984_v6 = vpop.permute.xlu0 %1983 }
0x2950   :  { %v1988_v3 = vmul.f32 %v1984_v6, %v1976_v60 }
0x2952   :  { %1993 = vrot.lane.b32.xlu0 %v1988_v3, %s2502_s2 }
0x29c1   :  { %v1992_v54 = vpop.permute.xlu1 %1991 }
0x29c2   :  { %v1997_v9 = vadd.f32 %v1992_v54, %v1977_v5  ;;  %v2259_v54 = vld [vmem:[#allocation4] ss:$0 sm:$0xff] }
0x29c4   :  { %2462 = vtanh.f32 %v1997_v9  ;;  %v1994_v21 = vpop.permute.xlu0 %1993 }
0x29c5   :  { %v1998_v29 = vadd.f32 %v1994_v21, %v1978_v10 }
0x29c7   :  { %2464 = vtanh.f32 %v1998_v29 }
0x29ce   :  { %v2463_v18 = vpop.eup %2462 }
0x29cf   :  { %2003 = vrot.lane.b32.xlu1 %v2463_v18, %s2501_s1 }
0x29d1   :  { %v2465_v48 = vpop.eup %2464 }
0x29d2   :  { %2005 = vrot.lane.b32.xlu0 %v2465_v48, %s2501_s1 }
0x2a41   :  { %v2004_v17 = vpop.permute.xlu1 %2003 }
0x2a42   :  { %v2009_v37 = vmul.f32 %v2004_v17, %v1975_v55  ;;  %v2299_v55 = vpack.c.bf16 %v2125_v30, %v2124_v49 }
0x2a44   :  { %v2006_v15 = vpop.permute.xlu0 %2005  ;;  %2300 = vmatpush3.bf16.msra.mxu0 %v2299_v55 }
0x2a45   :  { %v2010_v0 = vmul.f32 %v2006_v15, %v1976_v60 }
0x2a47   :  { %v2011_v13 = vpack.c.bf16 %v2010_v0, %v2009_v37 }
0x2a49   :  { %2013 = vrot.lane.b32.xlu1 %v2011_v13, %s2502_s2 }
0x2abb   :  { %v2014_v19 = vpop.permute.xlu1 %2013 }
0x2abc   :  { %2258 = vmatmul.mubr.msk.bf16.vlgmr.msra.gmra.mrb[48].mxu1 %vm273_vm12, %v2014_v19 }
0x2b8f   :  { %v2052_v20 = vpop.f32.mrb[48].mxu1 }
0x2b90   :  { %v2060_v16 = vadd.f32 %v2052_v20, %v3048_v33  ;;  %v2054_v25 = vpop.f32.mrb[49].mxu1 }
0x2b91   :  { %v2055_v8 = vpop.f32.mrb[50].mxu1 }
0x2b92   :  { %v2063_v12 = vmul.f32 0.5, %v2060_v16  ;;  %v2056_v22 = vpop.f32.mrb[51].mxu1 }
0x2b93   :  { %v2062_v23 = vadd.f32 %v2056_v22, %v3019_v52 }
0x2b94   :  { %v2065_v24 = vsel %vm2668_vm11, %v2060_v16, %v2063_v12 }
0x2b95   :  { %2466 = vtanh.f32 %v2065_v24  ;;  %v2064_v40 = vmul.f32 0.5, %v2062_v23 }
0x2b97   :  { %v2066_v27 = vsel %vm2668_vm11, %v2062_v23, %v2064_v40 }
0x2b98   :  { %2468 = vtanh.f32 %v2066_v27 }
0x2b9f   :  { %v2467_v39 = vpop.eup %2466 }
0x2ba0   :  { %v2069_v28 = vmul.f32 0.5, %v2467_v39 }
0x2ba2   :  { %v2469_v11 = vpop.eup %2468  ;;  %v2071_v31 = vadd.f32 0.5, %v2069_v28 }
0x2ba3   :  { %v2070_v33 = vmul.f32 0.5, %v2469_v11 }
0x2ba4   :  { %v2073_v4 = vsel %vm2668_vm11, %v2467_v39, %v2071_v31 }
0x2ba5   :  { %2079 = vrot.lane.b32.xlu0 %v2073_v4, %s2501_s1  ;;  %v2072_v52 = vadd.f32 0.5, %v2070_v33  ;;  %v2075_v38 = vmul.f32 %v2073_v4, %v1997_v9 }
0x2ba7   :  { %v2074_v32 = vsel %vm2668_vm11, %v2469_v11, %v2072_v52 }
0x2ba8   :  { %2081 = vrot.lane.b32.xlu1 %v2074_v32, %s2501_s1  ;;  %v2076_v42 = vmul.f32 %v2074_v32, %v1998_v29 }
0x2c17   :  { %v2080_v61 = vpop.permute.xlu0 %2079 }
0x2c18   :  { %v2085_v59 = vmul.f32 %v2080_v61, %v2073_v4 }
0x2c1a   :  { %2089 = vrot.lane.b32.xlu0 %v2085_v59, %s2502_s2  ;;  %v2082_v34 = vpop.permute.xlu1 %2081 }
0x2c1b   :  { %v2086_v35 = vmul.f32 %v2082_v34, %v2074_v32 }
0x2c1d   :  { %2091 = vrot.lane.b32.xlu1 %v2086_v35, %s2502_s2 }
0x2c8c   :  { %v2090_v41 = vpop.permute.xlu0 %2089 }
0x2c8d   :  { %v2095_v58 = vadd.f32 %v2090_v41, %v2075_v38 }
0x2c8f   :  { %2470 = vtanh.f32 %v2095_v58  ;;  %v2092_v57 = vpop.permute.xlu1 %2091 }
0x2c90   :  { %v2096_v62 = vadd.f32 %v2092_v57, %v2076_v42 }
0x2c92   :  { %2472 = vtanh.f32 %v2096_v62 }
0x2c99   :  { %v2471_v2 = vpop.eup %2470 }
0x2c9a   :  { %2101 = vrot.lane.b32.xlu0 %v2471_v2, %s2501_s1 }
0x2c9c   :  { %v2473_v56 = vpop.eup %2472 }
0x2c9d   :  { %2103 = vrot.lane.b32.xlu1 %v2473_v56, %s2501_s1 }
0x2d0c   :  { %v2102_v36 = vpop.permute.xlu0 %2101 }
0x2d0d   :  { %v2107_v60 = vmul.f32 %v2102_v36, %v2073_v4 }
0x2d0f   :  { %2110 = vrot.lane.b32.xlu0 %v2107_v60, %s2502_s2  ;;  %v2104_v14 = vpop.permute.xlu1 %2103 }
0x2d10   :  { %v2108_v63 = vmul.f32 %v2104_v14, %v2074_v32 }
0x2d12   :  { %2114 = vrot.lane.b32.xlu1 %v2108_v63, %s2501_s1 }
0x2d81   :  { %v2111_v6 = vpop.permute.xlu0 %2110 }
0x2d84   :  { %v2115_v3 = vpop.permute.xlu1 %2114 }
0x2d85   :  { %v2117_v5 = vsel %vm273_vm12, %v2111_v6, %v2115_v3 }
0x2d86   :  { %2287 = vmatmul.mubr.msk.f32.vlgmr.msra.gmra.mrb[44].mxu0 %vm147_vm2, %v2117_v5 }
0x2e59   :  { %v2202_v9 = vpop.f32.mrb[44].mxu0 }
0x2e5a   :  { %v2203_v10 = vadd.f32 %v2259_v54, %v2202_v9  ;;  %v2288_v21 = vpop.f32.mrb[45].mxu0 }
0x2e5c   :  { %2207 = vst.msk [vmem:[%s3247_s8] sm:$0xff] %vm2206_vm15, %v2203_v10 }
0x2e5d   :  { %2212 = vsyncpa [#allocation5], 1 }

</bundles_post_ra>
